<compile_context>
chip_gen: v7x
topology: tpu7x:2x2x1
jax: 0.10.0
libtpu: 0.0.40
codegen_flags: <defaults>
</compile_context>

<pallas_src>
import numpy as np
import jax
import jax.numpy as jnp
from jax.experimental import pallas as pl
from jax.experimental.pallas import tpu as pltpu


# ---------------------------------------------------------------------------
# Synthesized sub-module parameters (shapes follow the module __init__).
# ---------------------------------------------------------------------------
def init_params(key, n_basis, width, trunk_hidden=32, S=16):
    ks = jax.random.split(key, 8)

    def w(k, shape, fan_in):
        return jax.random.normal(k, shape, jnp.float32) / jnp.sqrt(float(fan_in))

    p = {}
    # branch = EncoderHelm2: conv(1->16,k3,s2,p1) -> conv(16->32,k3,s2,p1) -> fc
    p["bw1"] = w(ks[0], (9 * 1, 16), 9)            # rows: tap-major, chan-minor
    p["bb1"] = jnp.zeros((16,), jnp.float32)
    p["bw2"] = w(ks[1], (9 * 16, 32), 9 * 16)
    p["bb2"] = jnp.zeros((32,), jnp.float32)
    flat = 32 * (S // 4) * (S // 4)
    p["bw3"] = w(ks[2], (flat, n_basis), flat)     # NHWC (spatial-major) flatten
    p["bb3"] = jnp.zeros((n_basis,), jnp.float32)
    # trunk = FeedForwardNN(2 -> h -> h -> n_basis)
    p["tw1"] = w(ks[3], (2, trunk_hidden), 2)
    p["tb1"] = jnp.zeros((trunk_hidden,), jnp.float32)
    p["tw2"] = w(ks[4], (trunk_hidden, trunk_hidden), trunk_hidden)
    p["tb2"] = jnp.zeros((trunk_hidden,), jnp.float32)
    p["tw3"] = w(ks[5], (trunk_hidden, n_basis), trunk_hidden)
    p["tb3"] = jnp.zeros((n_basis,), jnp.float32)
    # fc0 = nn.Linear(3, width)  (torch layout: weight (width, 3), bias (width,))
    p["fc0_w"] = w(ks[6], (width, 3), 3)
    p["fc0_b"] = 0.1 * w(ks[7], (width,), 3)
    return p


# ---------------------------------------------------------------------------
# Weight preprocessing (done once, outside the kernel / outside jit):
# fold each stride-2 3x3 conv into a dense (H*H*Cin, Ho*Ho*Cout) matrix so the
# whole conv layer is one MXU matmul on a (L, lanes) activation slab.
# Input/output lane layout: spatial-major, channel-minor (NHWC flatten).
# ---------------------------------------------------------------------------
def _conv_as_matrix(Wc, H, Cin, Cout, k=3, s=2, pad=1):
    Ho = (H + 2 * pad - k) // s + 1
    sel = np.zeros((k * k, Ho * Ho, H * H), np.float32)
    for di in range(k):
        for dj in range(k):
            t = di * k + dj
            for oi in range(Ho):
                for oj in range(Ho):
                    i = s * oi + di - pad
                    j = s * oj + dj - pad
                    if 0 <= i < H and 0 <= j < H:          # zero padding -> no row
                        sel[t, oi * Ho + oj, i * H + j] = 1.0
    Wt = Wc.reshape(k * k, Cin, Cout)
    M = jnp.einsum("tps,tio->sipo", jnp.asarray(sel), Wt)
    return M.reshape(H * H * Cin, Ho * Ho * Cout)


def pack_params(p, L, S, n_basis):
    """Kernel-ready parameter set (dense conv matrices, transposed trunk,
    DeepONet scale folded in, fc0 reduced to its surviving row)."""
    del L  # L-averaging is handled inside the kernel via a mean over L
    Ho, Hq = S // 2, S // 4
    kp = {}
    kp["M1"] = _conv_as_matrix(p["bw1"], S, 1, 16).astype(jnp.bfloat16)
    kp["b1"] = jnp.tile(p["bb1"], Ho * Ho)[None, :]                  # (1, Ho*Ho*16)
    kp["M2"] = _conv_as_matrix(p["bw2"], Ho, 16, 32).astype(jnp.bfloat16)
    kp["b2"] = jnp.tile(p["bb2"], Hq * Hq)[None, :]                  # (1, Hq*Hq*32)
    kp["W3"] = p["bw3"]                                              # (flat, p)
    kp["b3"] = p["bb3"][None, :]                                     # (1, p)
    inv = 1.0 / jnp.sqrt(jnp.float32(n_basis))
    kp["Tw1"] = p["tw1"].T                                           # (h, 2)
    kp["Tb1"] = p["tb1"][:, None]                                    # (h, 1)
    kp["Tw2"] = p["tw2"].T
    kp["Tb2"] = p["tb2"][:, None]
    kp["Tw3"] = p["tw3"].T * inv        # DeepONet 1/sqrt(p) folded into trunk head
    kp["Tb3"] = p["tb3"][:, None] * inv
    # With fno n_layers == 0 only row 0 of fc0 survives the final [..., 0].
    kp["fc0"] = jnp.concatenate([p["fc0_w"][0, :], p["fc0_b"][0:1]])[None, :]  # (1,4)
    return kp


# ---------------------------------------------------------------------------
# Fused kernel: one grid step = one batch element; everything stays in VMEM.
# ---------------------------------------------------------------------------
def _leaky(v):
    return jnp.where(v > 0, v, 0.01 * v)


def _nio_fused_kernel(x_ref, gt_ref, m1_ref, b1_ref, m2_ref, b2_ref,
                      w3_ref, b3_ref, tw1_ref, tb1_ref, tw2_ref, tb2_ref,
                      tw3_ref, tb3_ref, fc0_ref, o_ref):
    f32 = jnp.float32

    # ---- branch (EncoderHelm2): conv1 + conv2 as single MXU matmuls (bf16
    #      operands, f32 accumulation), then the fully-connected head.
    x = x_ref[0]                                                # (L, S*S) f32
    h1 = jnp.dot(x.astype(jnp.bfloat16), m1_ref[...],
                 preferred_element_type=f32) + b1_ref[...]
    h1 = _leaky(h1)                                             # (L, 8*8*16)
    h2 = jnp.dot(h1.astype(jnp.bfloat16), m2_ref[...],
                 preferred_element_type=f32) + b2_ref[...]
    h2 = _leaky(h2)                                             # (L, 4*4*32)
    br = jnp.dot(h2, w3_ref[...], preferred_element_type=f32) + b3_ref[...]  # (L, p)

    # ---- trunk (FeedForwardNN) computed transposed: produces basis^T directly
    #      so the DeepONet contraction needs no transpose; 1/sqrt(p) pre-folded.
    gt = gt_ref[...]                                            # (2, N)
    t1 = _leaky(jnp.dot(tw1_ref[...], gt, preferred_element_type=f32) + tb1_ref[...])
    t2 = _leaky(jnp.dot(tw2_ref[...], t1, preferred_element_type=f32) + tb2_ref[...])
    bsT = jnp.dot(tw3_ref[...], t2, preferred_element_type=f32) + tb3_ref[...]  # (p, N)

    # ---- DeepOnetNoBiasOrg contraction + fc0 channel 0 (L-averaged column).
    d = jnp.dot(br, bsT, preferred_element_type=f32)            # (L, N)
    md = jnp.mean(d, axis=0, keepdims=True)                     # (1, N)
    w = fc0_ref[...]                                            # (1, 4)
    out = (gt[0:1, :] * w[:, 0:1] + gt[1:2, :] * w[:, 1:2]
           + md * w[:, 2:3] + w[:, 3:4])                        # (1, N)
    o_ref[0] = out


def nio_helm_perm_inv_abl_forward(kp, x, grid):
    """kp: packed params, x: (B, L, S, S) f32, grid: (nx, ny, 2) f32 -> (B, nx, ny)."""
    B, L, S, _ = x.shape
    nx, ny, _ = grid.shape
    N = nx * ny

    x_rows = x.reshape(B, L, S * S)       # contiguous reshape of the raw input
    gridT = grid.reshape(N, 2).T          # (2, N)

    def full(arr):                        # whole-array block, same block every step
        return pl.BlockSpec(arr.shape, lambda b, _nd=arr.ndim: (0,) * _nd)

    in_specs = [
        pl.BlockSpec((1, L, S * S), lambda b: (b, 0, 0)),       # x: one batch / step
        full(gridT),
        full(kp["M1"]), full(kp["b1"]), full(kp["M2"]), full(kp["b2"]),
        full(kp["W3"]), full(kp["b3"]),
        full(kp["Tw1"]), full(kp["Tb1"]), full(kp["Tw2"]), full(kp["Tb2"]),
        full(kp["Tw3"]), full(kp["Tb3"]), full(kp["fc0"]),
    ]

    out = pl.pallas_call(
        _nio_fused_kernel,
        out_shape=jax.ShapeDtypeStruct((B, 1, N), jnp.float32),
        grid=(B,),
        in_specs=in_specs,
        out_specs=pl.BlockSpec((1, 1, N), lambda b: (b, 0, 0)),
        compiler_params=pltpu.CompilerParams(
            dimension_semantics=("parallel",)),   # both v7x TensorCores get work
    )(x_rows, gridT, kp["M1"], kp["b1"], kp["M2"], kp["b2"], kp["W3"], kp["b3"],
      kp["Tw1"], kp["Tb1"], kp["Tw2"], kp["Tb2"], kp["Tw3"], kp["Tb3"], kp["fc0"])

    return out.reshape(B, nx, ny)


# ---------------------------------------------------------------------------
# Pure-JAX reference of the same synthesized model (follows the PyTorch glue
# literally: im2col convs, basis.T, grid concat, L-averaged fc0 weight, [...,0]).
# ---------------------------------------------------------------------------
def _im2col(x, k, s, p):
    x = jnp.pad(x, ((0, 0), (p, p), (p, p), (0, 0)))
    n, hp, wp, c = x.shape
    ho = (hp - k) // s + 1
    wo = (wp - k) // s + 1
    cols = []
    for di in range(k):
        for dj in range(k):
            cols.append(x[:, di:di + s * (ho - 1) + 1:s,
                          dj:dj + s * (wo - 1) + 1:s, :])
    return jnp.concatenate(cols, axis=-1).reshape(n * ho * wo, k * k * c), ho, wo


def reference_forward(p, x, grid, n_basis):
    B, L, S, _ = x.shape
    nx, ny, _ = grid.shape
    lrelu = lambda v: jnp.where(v > 0, v, 0.01 * v)
    h = x.reshape(B * L, S, S, 1)
    pat, ho, wo = _im2col(h, 3, 2, 1)
    h = lrelu(pat @ p["bw1"] + p["bb1"]).reshape(B * L, ho, wo, 16)
    pat, ho, wo = _im2col(h, 3, 2, 1)
    h = lrelu(pat @ p["bw2"] + p["bb2"]).reshape(B * L, ho, wo, 32).reshape(B * L, -1)
    branch = h @ p["bw3"] + p["bb3"]
    g = grid.reshape(-1, 2)
    t = lrelu(g @ p["tw1"] + p["tb1"])
    t = lrelu(t @ p["tw2"] + p["tb2"])
    basis = t @ p["tw3"] + p["tb3"]
    d = (branch @ basis.T) / jnp.sqrt(jnp.float32(n_basis))
    d = d.reshape(B, L, nx, ny)
    feat = jnp.concatenate(
        [jnp.broadcast_to(grid[None], (B, nx, ny, 2)),
         jnp.transpose(d, (0, 2, 3, 1))], axis=-1)
    W0 = p["fc0_w"]
    Wt = jnp.concatenate([W0[:, :2], jnp.repeat(W0[:, 2:3], L, axis=1) / L], axis=1)
    out = feat @ Wt.T + p["fc0_b"]
    return out[:, :, :, 0]


if __name__ == "__main__":
    key = jax.random.PRNGKey(0)
    k_x, k_p = jax.random.split(key)

    B, L, S = 2, 4, 16
    nx = ny = 8
    n_basis, width = 16, 32

    x = jax.random.normal(k_x, (B, L, S, S), jnp.float32)
    gx, gy = jnp.meshgrid(jnp.linspace(0.0, 1.0, nx),
                          jnp.linspace(0.0, 1.0, ny), indexing="ij")
    grid = jnp.stack([gx, gy], axis=-1).astype(jnp.float32)            # (nx, ny, 2)

    raw = init_params(k_p, n_basis, width, trunk_hidden=32, S=S)
    packed = pack_params(raw, L=L, S=S, n_basis=n_basis)   # one-time weight prep

    fwd = jax.jit(nio_helm_perm_inv_abl_forward)
    out = fwd(packed, x, grid)
    jax.block_until_ready(out)

    assert out.shape == (B, nx, ny), out.shape
    assert bool(jnp.all(jnp.isfinite(out)))

    with jax.default_matmul_precision("float32"):
        ref = reference_forward(raw, x, grid, n_basis)
    max_err = float(jnp.max(jnp.abs(out - ref)))
    assert jnp.allclose(out, ref, rtol=2e-2, atol=2e-2), max_err

    print("KERNEL_OK")
</pallas_src>

<mosaic_0001>
module attributes {stable_mosaic.version = 11 : i64} {
  func.func @_nio_fused_kernel(%arg0: i32, %arg1: memref<1x4x256xf32, #tpu.memory_space<vmem>>, %arg2: memref<2x64xf32, #tpu.memory_space<vmem>>, %arg3: memref<256x1024xbf16, #tpu.memory_space<vmem>>, %arg4: memref<1x1024xf32, #tpu.memory_space<vmem>>, %arg5: memref<1024x512xbf16, #tpu.memory_space<vmem>>, %arg6: memref<1x512xf32, #tpu.memory_space<vmem>>, %arg7: memref<512x16xf32, #tpu.memory_space<vmem>>, %arg8: memref<1x16xf32, #tpu.memory_space<vmem>>, %arg9: memref<32x2xf32, #tpu.memory_space<vmem>>, %arg10: memref<32x1xf32, #tpu.memory_space<vmem>>, %arg11: memref<32x32xf32, #tpu.memory_space<vmem>>, %arg12: memref<32x1xf32, #tpu.memory_space<vmem>>, %arg13: memref<16x32xf32, #tpu.memory_space<vmem>>, %arg14: memref<16x1xf32, #tpu.memory_space<vmem>>, %arg15: memref<1x4xf32, #tpu.memory_space<vmem>>, %arg16: memref<1x1x64xf32, #tpu.memory_space<vmem>>) attributes {dimension_semantics = [#tpu.dimension_semantics<parallel>], iteration_bounds = array<i64: 2>, scalar_prefetch = 0 : i64, scratch_operands = 0 : i64, tpu.core_type = #tpu.core_type<tc>, window_params = [{transform_indices = @transform_0, window_bounds = array<i64: 1, 4, 256>}, {pipeline_mode = #tpu.pipeline_mode<synchronous>, transform_indices = @transform_1, window_bounds = array<i64: 2, 64>}, {pipeline_mode = #tpu.pipeline_mode<synchronous>, transform_indices = @transform_2, window_bounds = array<i64: 256, 1024>}, {pipeline_mode = #tpu.pipeline_mode<synchronous>, transform_indices = @transform_3, window_bounds = array<i64: 1, 1024>}, {pipeline_mode = #tpu.pipeline_mode<synchronous>, transform_indices = @transform_4, window_bounds = array<i64: 1024, 512>}, {pipeline_mode = #tpu.pipeline_mode<synchronous>, transform_indices = @transform_5, window_bounds = array<i64: 1, 512>}, {pipeline_mode = #tpu.pipeline_mode<synchronous>, transform_indices = @transform_6, window_bounds = array<i64: 512, 16>}, {pipeline_mode = #tpu.pipeline_mode<synchronous>, transform_indices = @transform_7, window_bounds = array<i64: 1, 16>}, {pipeline_mode = #tpu.pipeline_mode<synchronous>, transform_indices = @transform_8, window_bounds = array<i64: 32, 2>}, {pipeline_mode = #tpu.pipeline_mode<synchronous>, transform_indices = @transform_9, window_bounds = array<i64: 32, 1>}, {pipeline_mode = #tpu.pipeline_mode<synchronous>, transform_indices = @transform_10, window_bounds = array<i64: 32, 32>}, {pipeline_mode = #tpu.pipeline_mode<synchronous>, transform_indices = @transform_11, window_bounds = array<i64: 32, 1>}, {pipeline_mode = #tpu.pipeline_mode<synchronous>, transform_indices = @transform_12, window_bounds = array<i64: 16, 32>}, {pipeline_mode = #tpu.pipeline_mode<synchronous>, transform_indices = @transform_13, window_bounds = array<i64: 16, 1>}, {pipeline_mode = #tpu.pipeline_mode<synchronous>, transform_indices = @transform_14, window_bounds = array<i64: 1, 4>}, {transform_indices = @transform_15, window_bounds = array<i64: 1, 1, 64>}]} {
    %c0 = arith.constant 0 : index
    %c0_0 = arith.constant 0 : index
    %c0_1 = arith.constant 0 : index
    %0 = vector.load %arg1[%c0, %c0_0, %c0_1] : memref<1x4x256xf32, #tpu.memory_space<vmem>>, vector<1x4x256xf32>
    %1 = vector.shape_cast %0 : vector<1x4x256xf32> to vector<4x256xf32>
    %2 = arith.truncf %1 : vector<4x256xf32> to vector<4x256xbf16>
    %c0_2 = arith.constant 0 : index
    %c0_3 = arith.constant 0 : index
    %3 = vector.load %arg3[%c0_2, %c0_3] : memref<256x1024xbf16, #tpu.memory_space<vmem>>, vector<256x1024xbf16>
    %cst = arith.constant dense<0.000000e+00> : vector<4x1024xf32>
    %4 = tpu.matmul %2, %3, %cst {dimension_numbers = #tpu.dot_dimension_numbers<[1], [0], [0], [1], [0, 0, 1, 1], [], []>} : vector<4x256xbf16>, vector<256x1024xbf16>, vector<4x1024xf32> -> vector<4x1024xf32>
    %c0_4 = arith.constant 0 : index
    %c0_5 = arith.constant 0 : index
    %5 = vector.load %arg4[%c0_4, %c0_5] : memref<1x1024xf32, #tpu.memory_space<vmem>>, vector<1x1024xf32>
    %6 = vector.broadcast %5 : vector<1x1024xf32> to vector<4x1024xf32>
    %7 = arith.addf %4, %6 : vector<4x1024xf32>
    %cst_6 = arith.constant 0.000000e+00 : f32
    %8 = vector.broadcast %cst_6 : f32 to vector<4x1024xf32>
    %9 = arith.cmpf ogt, %7, %8 : vector<4x1024xf32>
    %cst_7 = arith.constant 0.00999999977 : f32
    %10 = vector.broadcast %cst_7 : f32 to vector<4x1024xf32>
    %11 = arith.mulf %10, %7 : vector<4x1024xf32>
    %12 = arith.select %9, %7, %11 : vector<4x1024xi1>, vector<4x1024xf32>
    %13 = arith.truncf %12 : vector<4x1024xf32> to vector<4x1024xbf16>
    %c0_8 = arith.constant 0 : index
    %c0_9 = arith.constant 0 : index
    %14 = vector.load %arg5[%c0_8, %c0_9] : memref<1024x512xbf16, #tpu.memory_space<vmem>>, vector<1024x512xbf16>
    %cst_10 = arith.constant dense<0.000000e+00> : vector<4x512xf32>
    %15 = tpu.matmul %13, %14, %cst_10 {dimension_numbers = #tpu.dot_dimension_numbers<[1], [0], [0], [1], [0, 0, 1, 1], [], []>} : vector<4x1024xbf16>, vector<1024x512xbf16>, vector<4x512xf32> -> vector<4x512xf32>
    %c0_11 = arith.constant 0 : index
    %c0_12 = arith.constant 0 : index
    %16 = vector.load %arg6[%c0_11, %c0_12] : memref<1x512xf32, #tpu.memory_space<vmem>>, vector<1x512xf32>
    %17 = vector.broadcast %16 : vector<1x512xf32> to vector<4x512xf32>
    %18 = arith.addf %15, %17 : vector<4x512xf32>
    %cst_13 = arith.constant 0.000000e+00 : f32
    %19 = vector.broadcast %cst_13 : f32 to vector<4x512xf32>
    %20 = arith.cmpf ogt, %18, %19 : vector<4x512xf32>
    %cst_14 = arith.constant 0.00999999977 : f32
    %21 = vector.broadcast %cst_14 : f32 to vector<4x512xf32>
    %22 = arith.mulf %21, %18 : vector<4x512xf32>
    %23 = arith.select %20, %18, %22 : vector<4x512xi1>, vector<4x512xf32>
    %c0_15 = arith.constant 0 : index
    %c0_16 = arith.constant 0 : index
    %24 = vector.load %arg7[%c0_15, %c0_16] : memref<512x16xf32, #tpu.memory_space<vmem>>, vector<512x16xf32>
    %cst_17 = arith.constant dense<0.000000e+00> : vector<4x16xf32>
    %25 = tpu.matmul %23, %24, %cst_17 {dimension_numbers = #tpu.dot_dimension_numbers<[1], [0], [0], [1], [0, 0, 1, 1], [], []>} : vector<4x512xf32>, vector<512x16xf32>, vector<4x16xf32> -> vector<4x16xf32>
    %c0_18 = arith.constant 0 : index
    %c0_19 = arith.constant 0 : index
    %26 = vector.load %arg8[%c0_18, %c0_19] : memref<1x16xf32, #tpu.memory_space<vmem>>, vector<1x16xf32>
    %27 = vector.broadcast %26 : vector<1x16xf32> to vector<4x16xf32>
    %28 = arith.addf %25, %27 : vector<4x16xf32>
    %c0_20 = arith.constant 0 : index
    %c0_21 = arith.constant 0 : index
    %29 = vector.load %arg2[%c0_20, %c0_21] : memref<2x64xf32, #tpu.memory_space<vmem>>, vector<2x64xf32>
    %c0_22 = arith.constant 0 : index
    %c0_23 = arith.constant 0 : index
    %30 = vector.load %arg9[%c0_22, %c0_23] : memref<32x2xf32, #tpu.memory_space<vmem>>, vector<32x2xf32>
    %cst_24 = arith.constant dense<0.000000e+00> : vector<32x64xf32>
    %31 = tpu.matmul %30, %29, %cst_24 {dimension_numbers = #tpu.dot_dimension_numbers<[1], [0], [0], [1], [0, 0, 1, 1], [], []>} : vector<32x2xf32>, vector<2x64xf32>, vector<32x64xf32> -> vector<32x64xf32>
    %c0_25 = arith.constant 0 : index
    %c0_26 = arith.constant 0 : index
    %32 = vector.load %arg10[%c0_25, %c0_26] : memref<32x1xf32, #tpu.memory_space<vmem>>, vector<32x1xf32>
    %33 = vector.broadcast %32 : vector<32x1xf32> to vector<32x64xf32>
    %34 = arith.addf %31, %33 : vector<32x64xf32>
    %cst_27 = arith.constant 0.000000e+00 : f32
    %35 = vector.broadcast %cst_27 : f32 to vector<32x64xf32>
    %36 = arith.cmpf ogt, %34, %35 : vector<32x64xf32>
    %cst_28 = arith.constant 0.00999999977 : f32
    %37 = vector.broadcast %cst_28 : f32 to vector<32x64xf32>
    %38 = arith.mulf %37, %34 : vector<32x64xf32>
    %39 = arith.select %36, %34, %38 : vector<32x64xi1>, vector<32x64xf32>
    %c0_29 = arith.constant 0 : index
    %c0_30 = arith.constant 0 : index
    %40 = vector.load %arg11[%c0_29, %c0_30] : memref<32x32xf32, #tpu.memory_space<vmem>>, vector<32x32xf32>
    %cst_31 = arith.constant dense<0.000000e+00> : vector<32x64xf32>
    %41 = tpu.matmul %40, %39, %cst_31 {dimension_numbers = #tpu.dot_dimension_numbers<[1], [0], [0], [1], [0, 0, 1, 1], [], []>} : vector<32x32xf32>, vector<32x64xf32>, vector<32x64xf32> -> vector<32x64xf32>
    %c0_32 = arith.constant 0 : index
    %c0_33 = arith.constant 0 : index
    %42 = vector.load %arg12[%c0_32, %c0_33] : memref<32x1xf32, #tpu.memory_space<vmem>>, vector<32x1xf32>
    %43 = vector.broadcast %42 : vector<32x1xf32> to vector<32x64xf32>
    %44 = arith.addf %41, %43 : vector<32x64xf32>
    %cst_34 = arith.constant 0.000000e+00 : f32
    %45 = vector.broadcast %cst_34 : f32 to vector<32x64xf32>
    %46 = arith.cmpf ogt, %44, %45 : vector<32x64xf32>
    %cst_35 = arith.constant 0.00999999977 : f32
    %47 = vector.broadcast %cst_35 : f32 to vector<32x64xf32>
    %48 = arith.mulf %47, %44 : vector<32x64xf32>
    %49 = arith.select %46, %44, %48 : vector<32x64xi1>, vector<32x64xf32>
    %c0_36 = arith.constant 0 : index
    %c0_37 = arith.constant 0 : index
    %50 = vector.load %arg13[%c0_36, %c0_37] : memref<16x32xf32, #tpu.memory_space<vmem>>, vector<16x32xf32>
    %cst_38 = arith.constant dense<0.000000e+00> : vector<16x64xf32>
    %51 = tpu.matmul %50, %49, %cst_38 {dimension_numbers = #tpu.dot_dimension_numbers<[1], [0], [0], [1], [0, 0, 1, 1], [], []>} : vector<16x32xf32>, vector<32x64xf32>, vector<16x64xf32> -> vector<16x64xf32>
    %c0_39 = arith.constant 0 : index
    %c0_40 = arith.constant 0 : index
    %52 = vector.load %arg14[%c0_39, %c0_40] : memref<16x1xf32, #tpu.memory_space<vmem>>, vector<16x1xf32>
    %53 = vector.broadcast %52 : vector<16x1xf32> to vector<16x64xf32>
    %54 = arith.addf %51, %53 : vector<16x64xf32>
    %cst_41 = arith.constant dense<0.000000e+00> : vector<4x64xf32>
    %55 = tpu.matmul %28, %54, %cst_41 {dimension_numbers = #tpu.dot_dimension_numbers<[1], [0], [0], [1], [0, 0, 1, 1], [], []>} : vector<4x16xf32>, vector<16x64xf32>, vector<4x64xf32> -> vector<4x64xf32>
    %cst_42 = arith.constant dense<0.000000e+00> : vector<64xf32>
    %56 = vector.multi_reduction <add>, %55, %cst_42 [0] : vector<4x64xf32> to vector<64xf32>
    %57 = vector.shape_cast %56 : vector<64xf32> to vector<1x64xf32>
    %cst_43 = arith.constant 4.000000e+00 : f32
    %58 = vector.broadcast %cst_43 : f32 to vector<1x64xf32>
    %59 = arith.divf %57, %58 : vector<1x64xf32>
    %c0_44 = arith.constant 0 : index
    %c0_45 = arith.constant 0 : index
    %60 = vector.load %arg15[%c0_44, %c0_45] : memref<1x4xf32, #tpu.memory_space<vmem>>, vector<1x4xf32>
    %61 = vector.extract_strided_slice %29 {offsets = [0, 0], sizes = [1, 64], strides = [1, 1]} : vector<2x64xf32> to vector<1x64xf32>
    %62 = vector.extract_strided_slice %60 {offsets = [0, 0], sizes = [1, 1], strides = [1, 1]} : vector<1x4xf32> to vector<1x1xf32>
    %63 = vector.broadcast %62 : vector<1x1xf32> to vector<1x64xf32>
    %64 = arith.mulf %61, %63 : vector<1x64xf32>
    %65 = vector.extract_strided_slice %29 {offsets = [1, 0], sizes = [1, 64], strides = [1, 1]} : vector<2x64xf32> to vector<1x64xf32>
    %66 = vector.extract_strided_slice %60 {offsets = [0, 1], sizes = [1, 1], strides = [1, 1]} : vector<1x4xf32> to vector<1x1xf32>
    %67 = vector.broadcast %66 : vector<1x1xf32> to vector<1x64xf32>
    %68 = arith.mulf %65, %67 : vector<1x64xf32>
    %69 = arith.addf %64, %68 : vector<1x64xf32>
    %70 = vector.extract_strided_slice %60 {offsets = [0, 2], sizes = [1, 1], strides = [1, 1]} : vector<1x4xf32> to vector<1x1xf32>
    %71 = vector.broadcast %70 : vector<1x1xf32> to vector<1x64xf32>
    %72 = arith.mulf %59, %71 : vector<1x64xf32>
    %73 = arith.addf %69, %72 : vector<1x64xf32>
    %74 = vector.extract_strided_slice %60 {offsets = [0, 3], sizes = [1, 1], strides = [1, 1]} : vector<1x4xf32> to vector<1x1xf32>
    %75 = vector.broadcast %74 : vector<1x1xf32> to vector<1x64xf32>
    %76 = arith.addf %73, %75 : vector<1x64xf32>
    %c0_46 = arith.constant 0 : index
    %c0_47 = arith.constant 0 : index
    %c0_48 = arith.constant 0 : index
    %77 = vector.load %arg16[%c0_46, %c0_47, %c0_48] : memref<1x1x64xf32, #tpu.memory_space<vmem>>, vector<1x1x64xf32>
    %78 = vector.shape_cast %77 : vector<1x1x64xf32> to vector<1x64xf32>
    %79 = vector.shape_cast %76 : vector<1x64xf32> to vector<1x1x64xf32>
    tpu.vector_store %arg16[%c0_46, %c0_47, %c0_48], %79 {strides = array<i32>} : memref<1x1x64xf32, #tpu.memory_space<vmem>>, vector<1x1x64xf32>,
    return
  }
  func.func @transform_0(%arg0: i32) -> (i32, i32, i32) {
    %c0_i32 = arith.constant 0 : i32
    %c0_i32_0 = arith.constant 0 : i32
    %c0_i32_1 = arith.constant 0 : i32
    return %arg0, %c0_i32, %c0_i32_0 : i32, i32, i32
  }
  func.func @transform_1(%arg0: i32) -> (i32, i32) {
    %c0_i32 = arith.constant 0 : i32
    %c0_i32_0 = arith.constant 0 : i32
    %c0_i32_1 = arith.constant 0 : i32
    return %c0_i32, %c0_i32_0 : i32, i32
  }
  func.func @transform_2(%arg0: i32) -> (i32, i32) {
    %c0_i32 = arith.constant 0 : i32
    %c0_i32_0 = arith.constant 0 : i32
    %c0_i32_1 = arith.constant 0 : i32
    return %c0_i32, %c0_i32_0 : i32, i32
  }
  func.func @transform_3(%arg0: i32) -> (i32, i32) {
    %c0_i32 = arith.constant 0 : i32
    %c0_i32_0 = arith.constant 0 : i32
    %c0_i32_1 = arith.constant 0 : i32
    return %c0_i32, %c0_i32_0 : i32, i32
  }
  func.func @transform_4(%arg0: i32) -> (i32, i32) {
    %c0_i32 = arith.constant 0 : i32
    %c0_i32_0 = arith.constant 0 : i32
    %c0_i32_1 = arith.constant 0 : i32
    return %c0_i32, %c0_i32_0 : i32, i32
  }
  func.func @transform_5(%arg0: i32) -> (i32, i32) {
    %c0_i32 = arith.constant 0 : i32
    %c0_i32_0 = arith.constant 0 : i32
    %c0_i32_1 = arith.constant 0 : i32
    return %c0_i32, %c0_i32_0 : i32, i32
  }
  func.func @transform_6(%arg0: i32) -> (i32, i32) {
    %c0_i32 = arith.constant 0 : i32
    %c0_i32_0 = arith.constant 0 : i32
    %c0_i32_1 = arith.constant 0 : i32
    return %c0_i32, %c0_i32_0 : i32, i32
  }
  func.func @transform_7(%arg0: i32) -> (i32, i32) {
    %c0_i32 = arith.constant 0 : i32
    %c0_i32_0 = arith.constant 0 : i32
    %c0_i32_1 = arith.constant 0 : i32
    return %c0_i32, %c0_i32_0 : i32, i32
  }
  func.func @transform_8(%arg0: i32) -> (i32, i32) {
    %c0_i32 = arith.constant 0 : i32
    %c0_i32_0 = arith.constant 0 : i32
    %c0_i32_1 = arith.constant 0 : i32
    return %c0_i32, %c0_i32_0 : i32, i32
  }
  func.func @transform_9(%arg0: i32) -> (i32, i32) {
    %c0_i32 = arith.constant 0 : i32
    %c0_i32_0 = arith.constant 0 : i32
    %c0_i32_1 = arith.constant 0 : i32
    return %c0_i32, %c0_i32_0 : i32, i32
  }
  func.func @transform_10(%arg0: i32) -> (i32, i32) {
    %c0_i32 = arith.constant 0 : i32
    %c0_i32_0 = arith.constant 0 : i32
    %c0_i32_1 = arith.constant 0 : i32
    return %c0_i32, %c0_i32_0 : i32, i32
  }
  func.func @transform_11(%arg0: i32) -> (i32, i32) {
    %c0_i32 = arith.constant 0 : i32
    %c0_i32_0 = arith.constant 0 : i32
    %c0_i32_1 = arith.constant 0 : i32
    return %c0_i32, %c0_i32_0 : i32, i32
  }
  func.func @transform_12(%arg0: i32) -> (i32, i32) {
    %c0_i32 = arith.constant 0 : i32
    %c0_i32_0 = arith.constant 0 : i32
    %c0_i32_1 = arith.constant 0 : i32
    return %c0_i32, %c0_i32_0 : i32, i32
  }
  func.func @transform_13(%arg0: i32) -> (i32, i32) {
    %c0_i32 = arith.constant 0 : i32
    %c0_i32_0 = arith.constant 0 : i32
    %c0_i32_1 = arith.constant 0 : i32
    return %c0_i32, %c0_i32_0 : i32, i32
  }
  func.func @transform_14(%arg0: i32) -> (i32, i32) {
    %c0_i32 = arith.constant 0 : i32
    %c0_i32_0 = arith.constant 0 : i32
    %c0_i32_1 = arith.constant 0 : i32
    return %c0_i32, %c0_i32_0 : i32, i32
  }
  func.func @transform_15(%arg0: i32) -> (i32, i32, i32) {
    %c0_i32 = arith.constant 0 : i32
    %c0_i32_0 = arith.constant 0 : i32
    %c0_i32_1 = arith.constant 0 : i32
    return %arg0, %c0_i32, %c0_i32_0 : i32, i32, i32
  }
}

</mosaic_0001>

<bundles_post_ra>
// kernel: nio_helm_perm_inv_abl_forward.1
= control target key start
LH: loop header
LB: loop body
LE: loop exit
PB: predicated region body
PF: predicated region fallthrough
CT: control target
= control target key end

     0   :  { %s5923_s0 = inlined_call_operand.vmem [shape: f32[2,4,256], index: 0, kind: input, shape index: {}]   ;;  %s5924_s1 = inlined_call_operand.vmem [shape: f32[2,64], index: 1, kind: input, shape index: {}]   ;;  %s5925_s2 = inlined_call_operand.hbm [shape: bf16[256,1024], index: 2, kind: input, shape index: {}]   ;;  %s5926_s3 = inlined_call_operand.vmem [shape: f32[1,1024], index: 3, kind: input, shape index: {}]   ;;  %s5927_s4 = inlined_call_operand.hbm [shape: bf16[1024,512], index: 4, kind: input, shape index: {}]   ;;  %s5928_s5 = inlined_call_operand.vmem [shape: f32[1,512], index: 5, kind: input, shape index: {}]   ;;  %s5929_s6 = inlined_call_operand.vmem [shape: f32[512,16], index: 6, kind: input, shape index: {}]   ;;  %s5930_s7 = inlined_call_operand.vmem [shape: f32[1,16], index: 7, kind: input, shape index: {}]   ;;  %s5931_s8 = inlined_call_operand.vmem [shape: f32[32,2], index: 8, kind: input, shape index: {}]   ;;  %s5932_s9 = inlined_call_operand.vmem [shape: f32[32,1], index: 9, kind: input, shape index: {}]   ;;  %s5933_s10 = inlined_call_operand.vmem [shape: f32[32,32], index: 10, kind: input, shape index: {}]   ;;  %s5934_s11 = inlined_call_operand.vmem [shape: f32[32,1], index: 11, kind: input, shape index: {}]   ;;  %s5935_s12 = inlined_call_operand.vmem [shape: f32[16,32], index: 12, kind: input, shape index: {}]   ;;  %s5936_s13 = inlined_call_operand.vmem [shape: f32[16,1], index: 13, kind: input, shape index: {}]   ;;  %s5937_s14 = inlined_call_operand.vmem [shape: f32[1,4], index: 14, kind: input, shape index: {}]   ;;  %s5938_s15 = inlined_call_operand.vmem [shape: f32[2,1,64], index: 15, kind: output, shape index: {}]  }
   0x1   :  { %5942 = sst [smem:[#allocation9_spill]] %s5938_s15 }
   0x2   :  { %20 = vsyncpa [#allocation3], 0 }
   0x3   :  { %21 = vsyncpa [#allocation5], 0  ;;  %s5465_s18 = smov 0  }
   0x4 LB: > { %5943 = sst [smem:[#allocation8_spill]] %s5370_s18  ;;  %s5372_s19 = smov [#allocation2]   ;;  %s5370_s18 = sphi %s5465_s18, %s27_s18  }
   0x5   : > { %s393_s20 = sshll.u32 %s5372_s19, 4  ;;  %s5471_s21 = sadd.s32 4294967295, %s5370_s18   ;;  %s394_s20 = int_to_ptr.vmem [resolvable:$true] %s393_s20 }
   0x6   : > { %p4218_p0 = scmp.ge.s32.totalorder %s5370_s18, 1  ;;  %p378_p1 = scmp.lt.s32.totalorder %s5370_s18, 3 }
   0x7   : > { %p5939_p3 = scmp.eq.s32.totalorder %s5471_s21, 0  ;;  %s5373_s23 = smov [#allocation4]  }
   0x8   : > { %p5475_p2 = pnand %p4218_p0, %p378_p1  ;;  %s409_s24 = sshll.u32 %s5373_s23, 4  ;;  %s5488_s24 = int_to_ptr.vmem [resolvable:$true] %s409_s24 }
   0x9   : > { %s5300_s28 = scalar_lea.hbm %s5925_s2, 16384 }
   0xa   : > { %s5944_s22 = scalar_select %p5475_p2, 1, 0 }
   0xb   : > { %p4878_p4 = pneg %p5475_p2  ;;  %p5301_p6 = scmp.ne.s32.totalorder %s5925_s2, %s5300_s28 }
   0xc   : > { %p5307_p10 = scmp.lt.u32.totalorder %s5300_s28, %s5925_s2 }
   0xd   : > { %p5484_p5 = pnand %p5939_p3, %p4878_p4 }
   0xf   : > { %p5302_p7 = pneg %p5484_p5 }
  0x11   : > { %p5303_p8 = pnand %p5302_p7, %p5301_p6 }
  0x13   : > { %p5304_p9 = pneg %p5303_p8 }
  0x15   : > { %p5309_p11 = pnand %p5307_p10, %p5304_p9 }
  0x17   : > { %5312 = shalt.err (!%p5309_p11)
}
  0x18   : > { %s5313_s19 = scalar_lea.vmem %s394_s20, 16384  ;;  %p5321_p1 = scmp.lt.s32.totalorder %s394_s20, %s394_s20 }
  0x19   : > { %p5314_p12 = scmp.ne.s32.totalorder %s394_s20, %s5313_s19  ;;  %p5322_p4 = scmp.lt.s32.totalorder %s5313_s19, %s5313_s19 }
  0x1b   : > { %p5316_p13 = pnand %p5314_p12, %p5302_p7  ;;  %p5323_p3 = por %p5322_p4, %p5321_p1 }
  0x1d   : > { %p5317_p0 = pneg %p5316_p13 }
  0x1f   : > { %p5324_p2 = pnand %p5323_p3, %p5317_p0 }
  0x21   : > { %5327 = shalt.err (!%p5324_p2)
}
  0x22   : > { %s5374_s23 = smov 512   ;;  %s5375_s26 = smov 32  }
  0x23   : > { %4881 = dma.hbm_to_vmem [thread:$0]  (!%p5484_p5), %s5925_s2, 16384, %s394_s20, [#allocation3], %s5374_s23, %s5374_s23, %s5375_s26  }
  0x24   : > { %s5328_s16 = scalar_lea.hbm %s5927_s4, 32768 }
  0x25   : > { %p5329_p6 = scmp.ne.s32.totalorder %s5927_s4, %s5328_s16  ;;  %p5335_p8 = scmp.lt.u32.totalorder %s5328_s16, %s5927_s4 }
  0x27   : > { %p5331_p2 = pnand %p5329_p6, %p5302_p7 }
  0x29   : > { %p5332_p3 = pneg %p5331_p2 }
  0x2b   : > { %p5337_p9 = pnand %p5335_p8, %p5332_p3 }
  0x2d   : > { %5340 = shalt.err (!%p5337_p9)
}
  0x2e   : > { %s5341_s20 = scalar_lea.vmem %s5488_s24, 32768  ;;  %p5349_p13 = scmp.lt.s32.totalorder %s5488_s24, %s5488_s24 }
  0x2f   : > { %p5342_p10 = scmp.ne.s32.totalorder %s5488_s24, %s5341_s20  ;;  %p5350_p0 = scmp.lt.s32.totalorder %s5341_s20, %s5341_s20 }
  0x31   : > { %p5344_p11 = pnand %p5342_p10, %p5302_p7  ;;  %p5351_p1 = por %p5350_p0, %p5349_p13 }
  0x33   : > { %p5345_p12 = pneg %p5344_p11 }
  0x35   : > { %p5352_p4 = pnand %p5351_p1, %p5345_p12 }
  0x37   : > { %5355 = shalt.err (!%p5352_p4)
}
  0x38   : > { %s5376_s15 = smov 256   ;;  %s5377_s18 = smov 16  }
  0x39   : > { %4884 = dma.hbm_to_vmem [thread:$0]  (!%p5484_p5), %s5927_s4, 32768, %s5488_s24, [#allocation5], %s5376_s15, %s5376_s15, %s5377_s18  }
  0x3a   : > { %p5946_p6 = scmp.ne.s32.totalorder %s5944_s22, 0 }
  0x3b   : > { %p5947_p7 = scmp.eq.s32.totalorder (!%p5946_p6), %s5471_s21, 0 }
  0x3c   : > { %463 = sbr.rel (%p5946_p6) target bundleno = 1686 (0x696), region = 80 }
  0x43   : > { %5361 = dma.done.wait (%p5947_p7), [#allocation3], 16384   ;;  %p5948_p2 = pmov %p5947_p7 }
  0x45   : > { %5363 = vsyncadd (%p5948_p2), [#allocation3], 4294950912  ;;  %p5949_p3 = pmov %p5948_p2 }
  0x46   : > { %p5950_p8 = pmov %p5948_p2 }
  0x47   : > { %5365 = dma.done.wait (%p5949_p3), [#allocation5], 32768  }
  0x48   : > { %5367 = vsyncadd (%p5950_p8), [#allocation5], 4294934528  ;;  %p513_p9 = scmp.lt.s32.totalorder %s5471_s21, 1  ;;  %v527_v0 = vld [vmem:[#allocation2] sm:$0xff]  ;;  %v528_v17 = vld [vmem:[#allocation2 + $0x8] sm:$0xff]  ;;  %vm3684_vm8 = vcmask 1041408  }
  0x49   : > { %v531_v1 = vld [vmem:[#allocation2 + $0x20] sm:$0xff]  ;;  %v532_v18 = vld [vmem:[#allocation2 + $0x28] sm:$0xff]  ;;  %vm3671_vm13 = vcmask 15360   ;;  %vm3813_vm14 = vcmask 261120   ;;  %s5951_s28 = sld [smem:[#allocation9_spill]] }
  0x4a   : > { %v535_v2 = vld [vmem:[#allocation2 + $0x40] sm:$0xff]  ;;  %v4228_v3 = vcombine.high %v527_v0, %v531_v1  ;;  %v4227_v4 = vcombine.low %v527_v0, %v531_v1  ;;  %s5954_s21 = smov (!%p513_p9, %s5471_s21), 1  ;;  %v536_v20 = vld [vmem:[#allocation2 + $0x48] sm:$0xff]  ;;  %v4230_v22 = vcombine.high %v528_v17, %v532_v18  ;;  %v4229_v23 = vcombine.low %v528_v17, %v532_v18 }
  0x4b   : > { %v539_v5 = vld [vmem:[#allocation2 + $0x60] sm:$0xff]  ;;  %s4626_s22 = sshll.u32 %s5954_s21, 3  ;;  %v540_v25 = vld [vmem:[#allocation2 + $0x68] sm:$0xff] }
  0x4c   : > { %v4236_v6 = vcombine.high %v535_v2, %v539_v5  ;;  %v543_v7 = vld [vmem:[#allocation2 + $0x80] sm:$0xff]  ;;  %1337 = vmatprep.subr.bf16.mxu0 %v4228_v3  ;;  %v4235_v9 = vcombine.low %v535_v2, %v539_v5  ;;  %s517_s27 = scalar_lea.vmem %s5923_s0, %s4626_s22  ;;  %v4238_v27 = vcombine.high %v536_v20, %v540_v25  ;;  %v544_v28 = vld [vmem:[#allocation2 + $0x88] sm:$0xff]  ;;  %1378 = vmatprep.subr.bf16.mxu1 %v4230_v22 }
  0x4d   : > { %v547_v8 = vld [vmem:[#allocation2 + $0xa0] sm:$0xff]  ;;  %1338 = vmatpush1.bf16.msra.mxu0 %v4227_v4  ;;  %v548_v29 = vld [vmem:[#allocation2 + $0xa8] sm:$0xff]  ;;  %1379 = vmatpush1.bf16.msra.mxu1 %v4229_v23  ;;  %v4237_v33 = vcombine.low %v536_v20, %v540_v25 }
  0x4e   : > { %1339 = vmatprep.subr.bf16.mxu0 %v4236_v6  ;;  %v4244_v10 = vcombine.high %v543_v7, %v547_v8  ;;  %v551_v11 = vld [vmem:[#allocation2 + $0xc0] sm:$0xff]  ;;  %v4243_v13 = vcombine.low %v543_v7, %v547_v8  ;;  %v4246_v35 = vcombine.high %v544_v28, %v548_v29  ;;  %1380 = vmatprep.subr.bf16.mxu1 %v4238_v27  ;;  %v552_v37 = vld [vmem:[#allocation2 + $0xc8] sm:$0xff] }
  0x4f   : > { %v555_v12 = vld [vmem:[#allocation2 + $0xe0] sm:$0xff]  ;;  %v556_v38 = vld [vmem:[#allocation2 + $0xe8] sm:$0xff]  ;;  %v4245_v41 = vcombine.low %v544_v28, %v548_v29  ;;  %s520_s29 = scalar_lea.vmem %s5951_s28, %s5954_s21 }
  0x50   : > { %v4252_v14 = vcombine.high %v551_v11, %v555_v12  ;;  %v559_v15 = vld [vmem:[#allocation2 + $0x100] sm:$0xff]  ;;  %v4251_v21 = vcombine.low %v551_v11, %v555_v12  ;;  %v4254_v43 = vcombine.high %v552_v37, %v556_v38  ;;  %v560_v45 = vld [vmem:[#allocation2 + $0x108] sm:$0xff]  ;;  %v4253_v49 = vcombine.low %v552_v37, %v556_v38 }
  0x51   : > { %1340 = vmatpush1.bf16.msra.mxu0 %v4235_v9  ;;  %v563_v16 = vld [vmem:[#allocation2 + $0x120] sm:$0xff]  ;;  %1381 = vmatpush1.bf16.msra.mxu1 %v4237_v33  ;;  %v564_v46 = vld [vmem:[#allocation2 + $0x128] sm:$0xff] }
  0x52   : > { %1341 = vmatprep.subr.bf16.mxu0 %v4244_v10  ;;  %v5555_v19 = vld [vmem:[%s517_s27] sm:$0xff]  ;;  %v4260_v26 = vcombine.high %v559_v15, %v563_v16  ;;  %v4259_v34 = vcombine.low %v559_v15, %v563_v16  ;;  %1382 = vmatprep.subr.bf16.mxu1 %v4246_v35  ;;  %v4262_v51 = vcombine.high %v560_v45, %v564_v46  ;;  %v568_v53 = vld [vmem:[#allocation2 + $0x148] sm:$0xff] }
  0x53   : > { %v523_v24 = vcombine.high %v5555_v19, %v5555_v19  ;;  %v567_v30 = vld [vmem:[#allocation2 + $0x140] sm:$0xff]  ;;  %v572_v54 = vld [vmem:[#allocation2 + $0x168] sm:$0xff]  ;;  %v4261_v57 = vcombine.low %v560_v45, %v564_v46 }
  0x54   : > { %v571_v31 = vld [vmem:[#allocation2 + $0x160] sm:$0xff]  ;;  %v4270_v59 = vcombine.high %v568_v53, %v572_v54  ;;  %v576_v61 = vld [vmem:[#allocation2 + $0x188] sm:$0xff]  ;;  %v4269_v1 = vcombine.low %v568_v53, %v572_v54 }
  0x55   : > { %1342 = vmatpush1.bf16.msra.mxu0 %v4243_v13  ;;  %v5559_v32 = vpack.c.bf16 %v523_v24, %v523_v24  ;;  %v4268_v36 = vcombine.high %v567_v30, %v571_v31  ;;  %v575_v39 = vld [vmem:[#allocation2 + $0x180] sm:$0xff]  ;;  %v4267_v42 = vcombine.low %v567_v30, %v571_v31  ;;  %1383 = vmatpush1.bf16.msra.mxu1 %v4245_v41  ;;  %v580_v62 = vld [vmem:[#allocation2 + $0x1a8] sm:$0xff] }
  0x56   : > { %1343 = vmatprep.subr.bf16.mxu0 %v4252_v14  ;;  %v579_v40 = vld [vmem:[#allocation2 + $0x1a0] sm:$0xff]  ;;  %1384 = vmatprep.subr.bf16.mxu1 %v4254_v43  ;;  %v4278_v3 = vcombine.high %v576_v61, %v580_v62  ;;  %v584_v5 = vld [vmem:[#allocation2 + $0x1c8] sm:$0xff]  ;;  %v4277_v9 = vcombine.low %v576_v61, %v580_v62 }
  0x57   : > { %1369 = vmatprep.mubr.bf16.mxu0 %v5559_v32  ;;  %1410 = vmatprep.mubr.bf16.mxu1 %v5559_v32  ;;  %v4276_v44 = vcombine.high %v575_v39, %v579_v40  ;;  %v583_v47 = vld [vmem:[#allocation2 + $0x1c0] sm:$0xff]  ;;  %v4275_v50 = vcombine.low %v575_v39, %v579_v40  ;;  %v588_v6 = vld [vmem:[#allocation2 + $0x1e8] sm:$0xff] }
  0x58   : > { %v587_v48 = vld [vmem:[#allocation2 + $0x1e0] sm:$0xff]  ;;  %v4286_v11 = vcombine.high %v584_v5, %v588_v6  ;;  %v592_v13 = vld [vmem:[#allocation2 + $0x208] sm:$0xff]  ;;  %v4285_v17 = vcombine.low %v584_v5, %v588_v6 }
  0x59   : > { %1344 = vmatpush1.bf16.msra.mxu0 %v4251_v21  ;;  %v4284_v52 = vcombine.high %v583_v47, %v587_v48  ;;  %v591_v55 = vld [vmem:[#allocation2 + $0x200] sm:$0xff]  ;;  %1385 = vmatpush1.bf16.msra.mxu1 %v4253_v49  ;;  %v4283_v58 = vcombine.low %v583_v47, %v587_v48  ;;  %v596_v14 = vld [vmem:[#allocation2 + $0x228] sm:$0xff] }
  0x5a   : > { %1345 = vmatprep.subr.bf16.mxu0 %v4260_v26  ;;  %v595_v56 = vld [vmem:[#allocation2 + $0x220] sm:$0xff]  ;;  %1386 = vmatprep.subr.bf16.mxu1 %v4262_v51  ;;  %v4294_v20 = vcombine.high %v592_v13, %v596_v14  ;;  %v600_v22 = vld [vmem:[#allocation2 + $0x248] sm:$0xff]  ;;  %v4293_v26 = vcombine.low %v592_v13, %v596_v14 }
  0x5b   : > { %v4292_v60 = vcombine.high %v591_v55, %v595_v56  ;;  %v599_v63 = vld [vmem:[#allocation2 + $0x240] sm:$0xff]  ;;  %v4291_v2 = vcombine.low %v591_v55, %v595_v56  ;;  %v604_v23 = vld [vmem:[#allocation2 + $0x268] sm:$0xff] }
  0x5c   : > { %v603_v0 = vld [vmem:[#allocation2 + $0x260] sm:$0xff]  ;;  %v4302_v28 = vcombine.high %v600_v22, %v604_v23  ;;  %v608_v30 = vld [vmem:[#allocation2 + $0x288] sm:$0xff]  ;;  %v4301_v35 = vcombine.low %v600_v22, %v604_v23 }
  0x5d   : > { %1346 = vmatpush1.bf16.msra.mxu0 %v4259_v34  ;;  %1387 = vmatpush1.bf16.msra.mxu1 %v4261_v57  ;;  %v4300_v4 = vcombine.high %v599_v63, %v603_v0  ;;  %v607_v7 = vld [vmem:[#allocation2 + $0x280] sm:$0xff]  ;;  %v4299_v10 = vcombine.low %v599_v63, %v603_v0  ;;  %v612_v31 = vld [vmem:[#allocation2 + $0x2a8] sm:$0xff]  ;;  %v529_v57 = vld [vmem:[#allocation2 + $0x10] sm:$0xff] }
  0x5e   : > { %1347 = vmatprep.subr.bf16.mxu0 %v4268_v36  ;;  %1388 = vmatprep.subr.bf16.mxu1 %v4270_v59  ;;  %v611_v8 = vld [vmem:[#allocation2 + $0x2a0] sm:$0xff]  ;;  %v4310_v37 = vcombine.high %v608_v30, %v612_v31  ;;  %v616_v39 = vld [vmem:[#allocation2 + $0x2c8] sm:$0xff]  ;;  %v4309_v43 = vcombine.low %v608_v30, %v612_v31 }
  0x5f   : > { %v4308_v12 = vcombine.high %v607_v7, %v611_v8  ;;  %v615_v15 = vld [vmem:[#allocation2 + $0x2c0] sm:$0xff]  ;;  %v4307_v18 = vcombine.low %v607_v7, %v611_v8  ;;  %v620_v40 = vld [vmem:[#allocation2 + $0x2e8] sm:$0xff] }
  0x60   : > { %v619_v16 = vld [vmem:[#allocation2 + $0x2e0] sm:$0xff]  ;;  %v4318_v45 = vcombine.high %v616_v39, %v620_v40  ;;  %v624_v47 = vld [vmem:[#allocation2 + $0x308] sm:$0xff]  ;;  %v4317_v51 = vcombine.low %v616_v39, %v620_v40  ;;  %v577_v39 = vld [vmem:[#allocation2 + $0x190] sm:$0xff] }
  0x61   : > { %1348 = vmatpush1.bf16.msra.mxu0 %v4267_v42  ;;  %1389 = vmatpush1.bf16.msra.mxu1 %v4269_v1  ;;  %v4316_v21 = vcombine.high %v615_v15, %v619_v16  ;;  %v623_v24 = vld [vmem:[#allocation2 + $0x300] sm:$0xff]  ;;  %v4315_v27 = vcombine.low %v615_v15, %v619_v16  ;;  %v628_v48 = vld [vmem:[#allocation2 + $0x328] sm:$0xff]  ;;  %v537_v1 = vld [vmem:[#allocation2 + $0x50] sm:$0xff] }
  0x62   : > { %1349 = vmatprep.subr.bf16.mxu0 %v4276_v44  ;;  %1390 = vmatprep.subr.bf16.mxu1 %v4278_v3  ;;  %v627_v25 = vld [vmem:[#allocation2 + $0x320] sm:$0xff]  ;;  %v4326_v53 = vcombine.high %v624_v47, %v628_v48  ;;  %v632_v55 = vld [vmem:[#allocation2 + $0x348] sm:$0xff]  ;;  %v4325_v59 = vcombine.low %v624_v47, %v628_v48  ;;  %v5565_v3 = vpack.c.bf16 %v5555_v19, %v5555_v19  ;;  %v530_v15 = vld [vmem:[#allocation2 + $0x18] sm:$0xff] }
  0x63   : > { %v4324_v29 = vcombine.high %v623_v24, %v627_v25  ;;  %v631_v33 = vld [vmem:[#allocation2 + $0x340] sm:$0xff]  ;;  %v4323_v36 = vcombine.low %v623_v24, %v627_v25  ;;  %v636_v56 = vld [vmem:[#allocation2 + $0x368] sm:$0xff]  ;;  %v534_v16 = vld [vmem:[#allocation2 + $0x38] sm:$0xff] }
  0x64   : > { %v635_v34 = vld [vmem:[#allocation2 + $0x360] sm:$0xff]  ;;  %v4334_v61 = vcombine.high %v632_v55, %v636_v56  ;;  %v640_v62 = vld [vmem:[#allocation2 + $0x388] sm:$0xff]  ;;  %v4234_v22 = vcombine.high %v530_v15, %v534_v16  ;;  %v538_v24 = vld [vmem:[#allocation2 + $0x58] sm:$0xff] }
  0x65   : > { %1350 = vmatpush1.bf16.msra.mxu0 %v4275_v50  ;;  %1391 = vmatpush1.bf16.msra.mxu1 %v4277_v9  ;;  %v4332_v38 = vcombine.high %v631_v33, %v635_v34  ;;  %v639_v41 = vld [vmem:[#allocation2 + $0x380] sm:$0xff]  ;;  %v4331_v44 = vcombine.low %v631_v33, %v635_v34  ;;  %v644_v63 = vld [vmem:[#allocation2 + $0x3a8] sm:$0xff]  ;;  %v542_v25 = vld [vmem:[#allocation2 + $0x78] sm:$0xff] }
  0x66   : > { %1351 = vmatprep.subr.bf16.mxu0 %v4284_v52  ;;  %1392 = vmatprep.subr.bf16.mxu1 %v4286_v11  ;;  %v643_v42 = vld [vmem:[#allocation2 + $0x3a0] sm:$0xff]  ;;  %v4342_v5 = vcombine.high %v640_v62, %v644_v63  ;;  %v648_v7 = vld [vmem:[#allocation2 + $0x3c8] sm:$0xff]  ;;  %v549_v11 = vld [vmem:[#allocation2 + $0xb0] sm:$0xff]  ;;  %v4242_v30 = vcombine.high %v538_v24, %v542_v25 }
  0x67   : > { %v4340_v46 = vcombine.high %v639_v41, %v643_v42  ;;  %v647_v49 = vld [vmem:[#allocation2 + $0x3c0] sm:$0xff]  ;;  %v4339_v52 = vcombine.low %v639_v41, %v643_v42  ;;  %v652_v8 = vld [vmem:[#allocation2 + $0x3e8] sm:$0xff]  ;;  %v546_v33 = vld [vmem:[#allocation2 + $0x98] sm:$0xff] }
  0x68   : > { %v651_v50 = vld [vmem:[#allocation2 + $0x3e0] sm:$0xff]  ;;  %v4350_v13 = vcombine.high %v648_v7, %v652_v8  ;;  %v550_v34 = vld [vmem:[#allocation2 + $0xb8] sm:$0xff]  ;;  %v581_v40 = vld [vmem:[#allocation2 + $0x1b0] sm:$0xff] }
  0x69   : > { %1352 = vmatpush1.bf16.msra.mxu0 %v4283_v58  ;;  %1393 = vmatpush1.bf16.msra.mxu1 %v4285_v17  ;;  %v4348_v54 = vcombine.high %v647_v49, %v651_v50  ;;  %v533_v58 = vld [vmem:[#allocation2 + $0x30] sm:$0xff]  ;;  %v4250_v41 = vcombine.high %v546_v33, %v550_v34  ;;  %v554_v42 = vld [vmem:[#allocation2 + $0xd8] sm:$0xff] }
  0x6a   : > { %1353 = vmatprep.subr.bf16.mxu0 %v4292_v60  ;;  %1394 = vmatprep.subr.bf16.mxu1 %v4294_v20  ;;  %v4347_v60 = vcombine.low %v647_v49, %v651_v50  ;;  %v4232_v0 = vcombine.high %v529_v57, %v533_v58  ;;  %v4231_v6 = vcombine.low %v529_v57, %v533_v58  ;;  %v553_v17 = vld [vmem:[#allocation2 + $0xd0] sm:$0xff]  ;;  %v566_v47 = vld [vmem:[#allocation2 + $0x138] sm:$0xff] }
  0x6b   : > { %v4349_v20 = vcombine.low %v648_v7, %v652_v8  ;;  %v585_v49 = vld [vmem:[#allocation2 + $0x1d0] sm:$0xff]  ;;  %v590_v7 = vld [vmem:[#allocation2 + $0x1f8] sm:$0xff] }
  0x6c   : > { %v589_v50 = vld [vmem:[#allocation2 + $0x1f0] sm:$0xff] }
  0x6d   : > { %1354 = vmatpush1.bf16.msra.mxu0 %v4291_v2  ;;  %1395 = vmatpush1.bf16.msra.mxu1 %v4293_v26  ;;  %v541_v2 = vld [vmem:[#allocation2 + $0x70] sm:$0xff] }
  0x6e   : > { %1355 = vmatprep.subr.bf16.mxu0 %v4300_v4  ;;  %1396 = vmatprep.subr.bf16.mxu1 %v4302_v28  ;;  %v4333_v4 = vcombine.low %v632_v55, %v636_v56  ;;  %v4240_v9 = vcombine.high %v537_v1, %v541_v2  ;;  %v4239_v19 = vcombine.low %v537_v1, %v541_v2  ;;  %v561_v26 = vld [vmem:[#allocation2 + $0x110] sm:$0xff] }
  0x6f   : > { %v4233_v28 = vcombine.low %v530_v15, %v534_v16  ;;  %v4279_v55 = vcombine.low %v577_v39, %v581_v40  ;;  %v593_v56 = vld [vmem:[#allocation2 + $0x210] sm:$0xff] }
  0x70   : > { %v597_v57 = vld [vmem:[#allocation2 + $0x230] sm:$0xff] }
  0x71   : > { %1356 = vmatpush1.bf16.msra.mxu0 %v4299_v10  ;;  %1397 = vmatpush1.bf16.msra.mxu1 %v4301_v35  ;;  %v545_v10 = vld [vmem:[#allocation2 + $0x90] sm:$0xff]  ;;  %v4295_v8 = vcombine.low %v593_v56, %v597_v57 }
  0x72   : > { %1357 = vmatprep.subr.bf16.mxu0 %v4308_v12  ;;  %1398 = vmatprep.subr.bf16.mxu1 %v4310_v37  ;;  %v4341_v12 = vcombine.low %v640_v62, %v644_v63  ;;  %v4248_v14 = vcombine.high %v545_v10, %v549_v11  ;;  %v569_v35 = vld [vmem:[#allocation2 + $0x150] sm:$0xff]  ;;  %v4241_v37 = vcombine.low %v538_v24, %v542_v25  ;;  %v582_v62 = vld [vmem:[#allocation2 + $0x1b8] sm:$0xff] }
  0x73   : > { %v4287_v63 = vcombine.low %v585_v49, %v589_v50  ;;  %v605_v1 = vld [vmem:[#allocation2 + $0x270] sm:$0xff] }
  0x74   : > { %v617_v16 = vld [vmem:[#allocation2 + $0x2d0] sm:$0xff] }
  0x75   : > { %1358 = vmatpush1.bf16.msra.mxu0 %v4307_v18  ;;  %1399 = vmatpush1.bf16.msra.mxu1 %v4309_v43  ;;  %v557_v18 = vld [vmem:[#allocation2 + $0xf0] sm:$0xff]  ;;  %v558_v43 = vld [vmem:[#allocation2 + $0xf8] sm:$0xff] }
  0x76   : > { %1359 = vmatprep.subr.bf16.mxu0 %v4316_v21  ;;  %1400 = vmatprep.subr.bf16.mxu1 %v4318_v45  ;;  %v4247_v21 = vcombine.low %v545_v10, %v549_v11  ;;  %v4256_v23 = vcombine.high %v553_v17, %v557_v18  ;;  %v4249_v45 = vcombine.low %v546_v33, %v550_v34  ;;  %v613_v10 = vld [vmem:[#allocation2 + $0x2b0] sm:$0xff] }
  0x77   : > { %v625_v25 = vld [vmem:[#allocation2 + $0x310] sm:$0xff] }
  0x78   : > { %v633_v34 = vld [vmem:[#allocation2 + $0x350] sm:$0xff] }
  0x79   : > { %1360 = vmatpush1.bf16.msra.mxu0 %v4315_v27  ;;  %1401 = vmatpush1.bf16.msra.mxu1 %v4317_v51  ;;  %v565_v27 = vld [vmem:[#allocation2 + $0x130] sm:$0xff]  ;;  %v4280_v51 = vcombine.high %v577_v39, %v581_v40  ;;  %v618_v39 = vld [vmem:[#allocation2 + $0x2d8] sm:$0xff] }
  0x7a   : > { %1361 = vmatprep.subr.bf16.mxu0 %v4324_v29  ;;  %1402 = vmatprep.subr.bf16.mxu1 %v4326_v53  ;;  %v4255_v29 = vcombine.low %v553_v17, %v557_v18  ;;  %v4264_v31 = vcombine.high %v561_v26, %v565_v27  ;;  %v570_v53 = vld [vmem:[#allocation2 + $0x158] sm:$0xff]  ;;  %v621_v17 = vld [vmem:[#allocation2 + $0x2f0] sm:$0xff] }
  0x7b   : > { %v4319_v33 = vcombine.low %v617_v16, %v621_v17  ;;  %v622_v40 = vld [vmem:[#allocation2 + $0x2f8] sm:$0xff] }
  0x7d   : > { %1362 = vmatpush1.bf16.msra.mxu0 %v4323_v36  ;;  %1403 = vmatpush1.bf16.msra.mxu1 %v4325_v59  ;;  %v573_v36 = vld [vmem:[#allocation2 + $0x170] sm:$0xff]  ;;  %v4288_v59 = vcombine.high %v585_v49, %v589_v50 }
  0x7e   : > { %1363 = vmatprep.subr.bf16.mxu0 %v4332_v38  ;;  %1404 = vmatprep.subr.bf16.mxu1 %v4334_v61  ;;  %v4263_v38 = vcombine.low %v561_v26, %v565_v27  ;;  %v4271_v48 = vcombine.low %v569_v35, %v573_v36  ;;  %v578_v61 = vld [vmem:[#allocation2 + $0x198] sm:$0xff]  ;;  %v629_v26 = vld [vmem:[#allocation2 + $0x330] sm:$0xff] }
  0x7f   : > { %v4282_v11 = vcombine.high %v578_v61, %v582_v62  ;;  %v649_v50 = vld [vmem:[#allocation2 + $0x3d0] sm:$0xff] }
  0x81   : > { %1364 = vmatpush1.bf16.msra.mxu0 %v4331_v44  ;;  %1405 = vmatpush1.bf16.msra.mxu1 %v4333_v4  ;;  %v4272_v44 = vcombine.high %v569_v35, %v573_v36  ;;  %v4296_v4 = vcombine.high %v593_v56, %v597_v57  ;;  %v637_v35 = vld [vmem:[#allocation2 + $0x370] sm:$0xff] }
  0x82   : > { %1365 = vmatprep.subr.bf16.mxu0 %v4340_v46  ;;  %1406 = vmatprep.subr.bf16.mxu1 %v4342_v5  ;;  %v562_v46 = vld [vmem:[#allocation2 + $0x118] sm:$0xff]  ;;  %v4335_v49 = vcombine.low %v633_v34, %v637_v35 }
  0x83   : > { %v4266_v58 = vcombine.high %v562_v46, %v566_v47 }
  0x85   : > { %1366 = vmatpush1.bf16.msra.mxu0 %v4339_v52  ;;  %1407 = vmatpush1.bf16.msra.mxu1 %v4341_v12  ;;  %v4257_v52 = vcombine.low %v554_v42, %v558_v43 }
  0x86   : > { %1367 = vmatprep.subr.bf16.mxu0 %v4348_v54  ;;  %1408 = vmatprep.subr.bf16.mxu1 %v4350_v13  ;;  %v574_v54 = vld [vmem:[#allocation2 + $0x178] sm:$0xff]  ;;  %v4281_v13 = vcombine.low %v578_v61, %v582_v62  ;;  %v4918_v62 = vld [vmem:[#allocation4 + $0x4] ss:$16 sps:$4 sm:$0xff]  }
  0x87   : > { %v4274_v2 = vcombine.high %v570_v53, %v574_v54  ;;  %v4273_v5 = vcombine.low %v570_v53, %v574_v54  ;;  %v4321_v53 = vcombine.low %v618_v39, %v622_v40  ;;  %v634_v54 = vld [vmem:[#allocation2 + $0x358] sm:$0xff] }
  0x88   : > { %v646_v61 = vld [vmem:[#allocation2 + $0x3b8] sm:$0xff] }
  0x89   : > { %1368 = vmatpush1.bf16.msra.mxu0 %v4347_v60  ;;  %1409 = vmatpush1.bf16.msra.mxu1 %v4349_v20  ;;  %v4265_v60 = vcombine.low %v562_v46, %v566_v47  ;;  %v626_v47 = vld [vmem:[#allocation2 + $0x318] sm:$0xff] }
  0x8a   : > { %1419 = vmatprep.subr.bf16.mxu0 %v4232_v0  ;;  %1460 = vmatprep.subr.bf16.mxu1 %v4234_v22  ;;  %v601_v0 = vld [vmem:[#allocation2 + $0x250] sm:$0xff]  ;;  %v602_v22 = vld [vmem:[#allocation2 + $0x258] sm:$0xff] }
  0x8b   : > { %v4304_v12 = vcombine.high %v601_v0, %v605_v1  ;;  %v4303_v15 = vcombine.low %v601_v0, %v605_v1  ;;  %v4916_v1 = vld [vmem:[#allocation4] ss:$16 sps:$4 sm:$0xff]  }
  0x8c   : > { %1370 = vmatmul.mubr.bf16.vlgmr.msra.gmra.mrb[0].mxu0 %v5565_v3  ;;  %1411 = vmatmul.mubr.bf16.vlgmr.msra.gmra.mrb[0].mxu1 %v5565_v3 }
  0x8d   : > { %1420 = vmatpush1.bf16.msra.mxu0 %v4231_v6  ;;  %1451 = vmatprep.mubr.bf16.mxu0 %v5559_v32  ;;  %v586_v6 = vld [vmem:[#allocation2 + $0x1d8] sm:$0xff] }
  0x8e   : > { %1421 = vmatprep.subr.bf16.mxu0 %v4240_v9  ;;  %1461 = vmatpush1.bf16.msra.mxu1 %v4233_v28  ;;  %v609_v9 = vld [vmem:[#allocation2 + $0x290] sm:$0xff]  ;;  %v4290_v18 = vcombine.high %v586_v6, %v590_v7  ;;  %v4320_v28 = vcombine.high %v617_v16, %v621_v17  ;;  %v4927_v16 = vld [vmem:[#allocation4 + $0x2c] ss:$16 sps:$4 sm:$0xff]  }
  0x8f   : > { %1492 = vmatprep.mubr.bf16.mxu1 %v5559_v32  ;;  %1462 = vmatprep.subr.bf16.mxu1 %v4242_v30  ;;  %v4258_v32 = vcombine.high %v554_v42, %v558_v43  ;;  %v4312_v20 = vcombine.high %v609_v9, %v613_v10  ;;  %v4311_v24 = vcombine.low %v609_v9, %v613_v10  ;;  %v610_v30 = vld [vmem:[#allocation2 + $0x298] sm:$0xff]  ;;  %v641_v42 = vld [vmem:[#allocation2 + $0x390] sm:$0xff] }
  0x90   : > { %v645_v43 = vld [vmem:[#allocation2 + $0x3b0] sm:$0xff] }
  0x91   : > { %1422 = vmatpush1.bf16.msra.mxu0 %v4239_v19  ;;  %v594_v19 = vld [vmem:[#allocation2 + $0x218] sm:$0xff]  ;;  %v4343_v56 = vcombine.low %v641_v42, %v645_v43  ;;  %v4930_v10 = vld [vmem:[#allocation4 + $0x44] ss:$16 sps:$4 sm:$0xff]   ;;  %v4934_v17 = vld [vmem:[#allocation4 + $0x60] ss:$16 sps:$4 sm:$0xff]  }
  0x92   : > { %1423 = vmatprep.subr.bf16.mxu0 %v4248_v14  ;;  %1463 = vmatpush1.bf16.msra.mxu1 %v4241_v37  ;;  %v598_v14 = vld [vmem:[#allocation2 + $0x238] sm:$0xff]  ;;  %v4328_v37 = vcombine.high %v625_v25, %v629_v26 }
  0x93   : > { %1464 = vmatprep.subr.bf16.mxu1 %v4250_v41  ;;  %v4298_v27 = vcombine.high %v594_v19, %v598_v14  ;;  %v4327_v41 = vcombine.low %v625_v25, %v629_v26  ;;  %v4939_v25 = vld [vmem:[#allocation4 + $0x6c] ss:$16 sps:$4 sm:$0xff]   ;;  %v4946_v26 = vld [vmem:[#allocation4 + $0xa0] ss:$16 sps:$4 sm:$0xff]  }
  0x95   : > { %1424 = vmatpush1.bf16.msra.mxu0 %v4247_v21  ;;  %v4289_v21 = vcombine.low %v586_v6, %v590_v7  ;;  %v4924_v6 = vld [vmem:[#allocation4 + $0x24] ss:$16 sps:$4 sm:$0xff]  }
  0x96   : > { %1425 = vmatprep.subr.bf16.mxu0 %v4256_v23  ;;  %1465 = vmatpush1.bf16.msra.mxu1 %v4249_v45  ;;  %v606_v23 = vld [vmem:[#allocation2 + $0x278] sm:$0xff]  ;;  %v4336_v45 = vcombine.high %v633_v34, %v637_v35  ;;  %v4958_v34 = vld [vmem:[#allocation4 + $0xe0] ss:$16 sps:$4 sm:$0xff]   ;;  %v4966_v35 = vld [vmem:[#allocation4 + $0x104] ss:$16 sps:$4 sm:$0xff]  }
  0x97   : > { %1466 = vmatprep.subr.bf16.mxu1 %v4258_v32  ;;  %v4306_v36 = vcombine.high %v602_v22, %v606_v23  ;;  %v653_v32 = vld [vmem:[#allocation2 + $0x3f0] sm:$0xff] }
  0x99   : > { %1426 = vmatpush1.bf16.msra.mxu0 %v4255_v29  ;;  %v4297_v29 = vcombine.low %v594_v19, %v598_v14  ;;  %v4936_v14 = vld [vmem:[#allocation4 + $0x64] ss:$16 sps:$4 sm:$0xff]  }
  0x9a   : > { %1427 = vmatprep.subr.bf16.mxu0 %v4264_v31  ;;  %1467 = vmatpush1.bf16.msra.mxu1 %v4257_v52  ;;  %v614_v31 = vld [vmem:[#allocation2 + $0x2b8] sm:$0xff]  ;;  %v4344_v52 = vcombine.high %v641_v42, %v645_v43  ;;  %v4970_v42 = vld [vmem:[#allocation4 + $0x120] ss:$16 sps:$4 sm:$0xff]   ;;  %v4978_v43 = vld [vmem:[#allocation4 + $0x144] ss:$16 sps:$4 sm:$0xff]  }
  0x9b   : > { %1468 = vmatprep.subr.bf16.mxu1 %v4266_v58  ;;  %v4313_v46 = vcombine.low %v610_v30, %v614_v31  ;;  %v4352_v58 = vcombine.high %v649_v50, %v653_v32 }
  0x9d   : > { %1428 = vmatpush1.bf16.msra.mxu0 %v4263_v38  ;;  %v4305_v38 = vcombine.low %v602_v22, %v606_v23  ;;  %v4940_v22 = vld [vmem:[#allocation4 + $0x80] ss:$16 sps:$4 sm:$0xff]   ;;  %v4948_v23 = vld [vmem:[#allocation4 + $0xa4] ss:$16 sps:$4 sm:$0xff]  }
  0x9e   : > { %1429 = vmatprep.subr.bf16.mxu0 %v4272_v44  ;;  %1469 = vmatpush1.bf16.msra.mxu1 %v4265_v60  ;;  %v4314_v44 = vcombine.high %v610_v30, %v614_v31  ;;  %v642_v60 = vld [vmem:[#allocation2 + $0x398] sm:$0xff]  ;;  %v4960_v30 = vld [vmem:[#allocation4 + $0xe4] ss:$16 sps:$4 sm:$0xff]  }
  0x9f   : > { %1470 = vmatprep.subr.bf16.mxu1 %v4274_v2  ;;  %v4346_v7 = vcombine.high %v642_v60, %v646_v61  ;;  %v4345_v9 = vcombine.low %v642_v60, %v646_v61  ;;  %v4943_v31 = vld [vmem:[#allocation4 + $0x88] ss:$16 sps:$4 sm:$0xff]   ;;  %v4993_v60 = vld [vmem:[#allocation4 + $0x18c] ss:$16 sps:$4 sm:$0xff]   ;;  %v5000_v61 = vld [vmem:[#allocation4 + $0x1c0] ss:$16 sps:$4 sm:$0xff]  }
  0xa1   : > { %1430 = vmatpush1.bf16.msra.mxu0 %v4271_v48  ;;  %v630_v48 = vld [vmem:[#allocation2 + $0x338] sm:$0xff] }
  0xa2   : > { %1431 = vmatprep.subr.bf16.mxu0 %v4280_v51  ;;  %1471 = vmatpush1.bf16.msra.mxu1 %v4273_v5  ;;  %v4322_v51 = vcombine.high %v618_v39, %v622_v40  ;;  %v4330_v57 = vcombine.high %v626_v47, %v630_v48  ;;  %v654_v5 = vld [vmem:[#allocation2 + $0x3f8] sm:$0xff]  ;;  %v4972_v39 = vld [vmem:[#allocation4 + $0x124] ss:$16 sps:$4 sm:$0xff]  }
  0xa3   : > { %1472 = vmatprep.subr.bf16.mxu1 %v4282_v11  ;;  %v4955_v40 = vld [vmem:[#allocation4 + $0xc8] ss:$16 sps:$4 sm:$0xff]  }
  0xa5   : > { %1432 = vmatpush1.bf16.msra.mxu0 %v4279_v55  ;;  %v638_v55 = vld [vmem:[#allocation2 + $0x378] sm:$0xff] }
  0xa6   : > { %1433 = vmatprep.subr.bf16.mxu0 %v4288_v59  ;;  %1473 = vmatpush1.bf16.msra.mxu1 %v4281_v13  ;;  %v4329_v59 = vcombine.low %v626_v47, %v630_v48  ;;  %v4338_v0 = vcombine.high %v634_v54, %v638_v55  ;;  %v4337_v2 = vcombine.low %v634_v54, %v638_v55  ;;  %v4928_v13 = vld [vmem:[#allocation4 + $0x40] ss:$16 sps:$4 sm:$0xff]   ;;  %v4984_v47 = vld [vmem:[#allocation4 + $0x164] ss:$16 sps:$4 sm:$0xff]   ;;  %v4967_v48 = vld [vmem:[#allocation4 + $0x108] ss:$16 sps:$4 sm:$0xff]  }
  0xa7   : > { %1474 = vmatprep.subr.bf16.mxu1 %v4290_v18  ;;  %v4942_v18 = vld [vmem:[#allocation4 + $0x84] ss:$16 sps:$4 sm:$0xff]   ;;  %v4979_v55 = vld [vmem:[#allocation4 + $0x148] ss:$16 sps:$4 sm:$0xff]  }
  0xa8   : > { %v4996_v54 = vld [vmem:[#allocation4 + $0x1a4] ss:$16 sps:$4 sm:$0xff]  }
  0xa9   : > { %1434 = vmatpush1.bf16.msra.mxu0 %v4287_v63  ;;  %v4351_v63 = vcombine.low %v649_v50, %v653_v32  ;;  %v4982_v50 = vld [vmem:[#allocation4 + $0x160] ss:$16 sps:$4 sm:$0xff]   ;;  %v4990_v32 = vld [vmem:[#allocation4 + $0x184] ss:$16 sps:$4 sm:$0xff]  }
  0xaa   : > { %1435 = vmatprep.subr.bf16.mxu0 %v4296_v4  ;;  %1475 = vmatpush1.bf16.msra.mxu1 %v4289_v21  ;;  %v650_v4 = vld [vmem:[#allocation2 + $0x3d8] sm:$0xff] }
  0xab   : > { %1476 = vmatprep.subr.bf16.mxu1 %v4298_v27  ;;  %v4354_v11 = vcombine.high %v650_v4, %v654_v5  ;;  %v4353_v19 = vcombine.low %v650_v4, %v654_v5  ;;  %v4933_v21 = vld [vmem:[#allocation4 + $0x4c] ss:$16 sps:$4 sm:$0xff]   ;;  %v4954_v27 = vld [vmem:[#allocation4 + $0xc4] ss:$16 sps:$4 sm:$0xff]   ;;  %v4997_v4 = vld [vmem:[#allocation4 + $0x1a8] ss:$16 sps:$4 sm:$0xff]  }
  0xac   : > { %v5005_v5 = vld [vmem:[#allocation4 + $0x1cc] ss:$16 sps:$4 sm:$0xff]  }
  0xad   : > { %1436 = vmatpush1.bf16.msra.mxu0 %v4295_v8  ;;  %v4922_v8 = vld [vmem:[#allocation4 + $0x20] ss:$16 sps:$4 sm:$0xff]  }
  0xae   : > { %1437 = vmatprep.subr.bf16.mxu0 %v4304_v12  ;;  %1477 = vmatpush1.bf16.msra.mxu1 %v4297_v29  ;;  %v4921_v12 = vld [vmem:[#allocation4 + $0xc] ss:$16 sps:$4 sm:$0xff]  }
  0xaf   : > { %1478 = vmatprep.subr.bf16.mxu1 %v4306_v36  ;;  %v4945_v29 = vld [vmem:[#allocation4 + $0x8c] ss:$16 sps:$4 sm:$0xff]   ;;  %v4949_v36 = vld [vmem:[#allocation4 + $0xa8] ss:$16 sps:$4 sm:$0xff]  }
  0xb1   : > { %1438 = vmatpush1.bf16.msra.mxu0 %v4303_v15  ;;  %v4919_v15 = vld [vmem:[#allocation4 + $0x8] ss:$16 sps:$4 sm:$0xff]  }
  0xb2   : > { %1439 = vmatprep.subr.bf16.mxu0 %v4312_v20  ;;  %1479 = vmatpush1.bf16.msra.mxu1 %v4305_v38  ;;  %v4925_v20 = vld [vmem:[#allocation4 + $0x28] ss:$16 sps:$4 sm:$0xff]   ;;  %v4964_v38 = vld [vmem:[#allocation4 + $0x100] ss:$16 sps:$4 sm:$0xff]  }
  0xb3   : > { %1480 = vmatprep.subr.bf16.mxu1 %v4314_v44  ;;  %v4961_v44 = vld [vmem:[#allocation4 + $0xe8] ss:$16 sps:$4 sm:$0xff]  }
  0xb5   : > { %1440 = vmatpush1.bf16.msra.mxu0 %v4311_v24  ;;  %v4931_v24 = vld [vmem:[#allocation4 + $0x48] ss:$16 sps:$4 sm:$0xff]  }
  0xb6   : > { %1441 = vmatprep.subr.bf16.mxu0 %v4320_v28  ;;  %1481 = vmatpush1.bf16.msra.mxu1 %v4313_v46  ;;  %v4937_v28 = vld [vmem:[#allocation4 + $0x68] ss:$16 sps:$4 sm:$0xff]   ;;  %v4976_v46 = vld [vmem:[#allocation4 + $0x140] ss:$16 sps:$4 sm:$0xff]  }
  0xb7   : > { %1482 = vmatprep.subr.bf16.mxu1 %v4322_v51  ;;  %v4973_v51 = vld [vmem:[#allocation4 + $0x128] ss:$16 sps:$4 sm:$0xff]  }
  0xb9   : > { %1442 = vmatpush1.bf16.msra.mxu0 %v4319_v33  ;;  %v4951_v33 = vld [vmem:[#allocation4 + $0xac] ss:$16 sps:$4 sm:$0xff]  }
  0xba   : > { %1443 = vmatprep.subr.bf16.mxu0 %v4328_v37  ;;  %1483 = vmatpush1.bf16.msra.mxu1 %v4321_v53  ;;  %v4957_v37 = vld [vmem:[#allocation4 + $0xcc] ss:$16 sps:$4 sm:$0xff]   ;;  %v4988_v53 = vld [vmem:[#allocation4 + $0x180] ss:$16 sps:$4 sm:$0xff]  }
  0xbb   : > { %1484 = vmatprep.subr.bf16.mxu1 %v4330_v57  ;;  %v4994_v57 = vld [vmem:[#allocation4 + $0x1a0] ss:$16 sps:$4 sm:$0xff]  }
  0xbd   : > { %1444 = vmatpush1.bf16.msra.mxu0 %v4327_v41  ;;  %v4963_v41 = vld [vmem:[#allocation4 + $0xec] ss:$16 sps:$4 sm:$0xff]  }
  0xbe   : > { %1445 = vmatprep.subr.bf16.mxu0 %v4336_v45  ;;  %1485 = vmatpush1.bf16.msra.mxu1 %v4329_v59  ;;  %v4969_v45 = vld [vmem:[#allocation4 + $0x10c] ss:$16 sps:$4 sm:$0xff]   ;;  %v4985_v59 = vld [vmem:[#allocation4 + $0x168] ss:$16 sps:$4 sm:$0xff]  }
  0xbf   : > { %1486 = vmatprep.subr.bf16.mxu1 %v4338_v0  ;;  %v4999_v0 = vld [vmem:[#allocation4 + $0x1ac] ss:$16 sps:$4 sm:$0xff]  }
  0xc1   : > { %1446 = vmatpush1.bf16.msra.mxu0 %v4335_v49  ;;  %v4975_v49 = vld [vmem:[#allocation4 + $0x12c] ss:$16 sps:$4 sm:$0xff]  }
  0xc2   : > { %1447 = vmatprep.subr.bf16.mxu0 %v4344_v52  ;;  %1487 = vmatpush1.bf16.msra.mxu1 %v4337_v2  ;;  %v4981_v52 = vld [vmem:[#allocation4 + $0x14c] ss:$16 sps:$4 sm:$0xff]   ;;  %v5014_v2 = vld [vmem:[#allocation4 + $0x204] ss:$16 sps:$4 sm:$0xff]  }
  0xc3   : > { %1488 = vmatprep.subr.bf16.mxu1 %v4346_v7  ;;  %v5011_v7 = vld [vmem:[#allocation4 + $0x1ec] ss:$16 sps:$4 sm:$0xff]  }
  0xc5   : > { %1448 = vmatpush1.bf16.msra.mxu0 %v4343_v56  ;;  %v4987_v56 = vld [vmem:[#allocation4 + $0x16c] ss:$16 sps:$4 sm:$0xff]  }
  0xc6   : > { %1449 = vmatprep.subr.bf16.mxu0 %v4352_v58  ;;  %1489 = vmatpush1.bf16.msra.mxu1 %v4345_v9  ;;  %v5002_v58 = vld [vmem:[#allocation4 + $0x1c4] ss:$16 sps:$4 sm:$0xff]   ;;  %v5017_v9 = vld [vmem:[#allocation4 + $0x20c] ss:$16 sps:$4 sm:$0xff]  }
  0xc7   : > { %1490 = vmatprep.subr.bf16.mxu1 %v4354_v11 }
  0xc9   : > { %1450 = vmatpush1.bf16.msra.mxu0 %v4351_v63  ;;  %v4991_v63 = vld [vmem:[#allocation4 + $0x188] ss:$16 sps:$4 sm:$0xff]  }
  0xca   : > { %3091 = vmatprep.subr.bf16.mxu0 %v4918_v62  ;;  %1491 = vmatpush1.bf16.msra.mxu1 %v4353_v19  ;;  %v5008_v62 = vld [vmem:[#allocation4 + $0x1e4] ss:$16 sps:$4 sm:$0xff]  }
  0xcb   : > { %3255 = vmatprep.subr.bf16.mxu1 %v4921_v12 }
  0xcc   : > { %1452 = vmatmul.mubr.bf16.vlgmr.msra.gmra.mrb[4].mxu0 %v5565_v3 }
  0xcd   : > { %3092 = vmatpush1.bf16.msra.mxu0 %v4916_v1  ;;  %1493 = vmatmul.mubr.bf16.vlgmr.msra.gmra.mrb[4].mxu1 %v5565_v3  ;;  %v4952_v3 = vld [vmem:[#allocation4 + $0xc0] ss:$16 sps:$4 sm:$0xff]  }
  0xce   : > { %3093 = vmatprep.subr.bf16.mxu0 %v4924_v6  ;;  %3256 = vmatpush1.bf16.msra.mxu1 %v4919_v15  ;;  %v5006_v1 = vld [vmem:[#allocation4 + $0x1e0] ss:$16 sps:$4 sm:$0xff]   ;;  %v5003_v6 = vld [vmem:[#allocation4 + $0x1c8] ss:$16 sps:$4 sm:$0xff]  }
  0xcf   : > { %3257 = vmatprep.subr.bf16.mxu1 %v4927_v16 }
  0xd1   : > { %3094 = vmatpush1.bf16.msra.mxu0 %v4922_v8  ;;  %v5009_v8 = vld [vmem:[#allocation4 + $0x1e8] ss:$16 sps:$4 sm:$0xff]  }
  0xd2   : > { %3095 = vmatprep.subr.bf16.mxu0 %v4930_v10  ;;  %3258 = vmatpush1.bf16.msra.mxu1 %v4925_v20  ;;  %v657_v10 = vlaneseq }
  0xd3   : > { %3259 = vmatprep.subr.bf16.mxu1 %v4933_v21 }
  0xd4   : > { %v5573_v11 = vshrl.u32 %v657_v10, 7  ;;  %v5071_v10 = vld [vmem:[#allocation4 + $0x32c] ss:$16 sps:$4 sm:$0xff]  }
  0xd5   : > { %3096 = vmatpush1.bf16.msra.mxu0 %v4928_v13  ;;  %v5581_v13 = vld [vmem:[%s5926_s3] sm:$0xff] }
  0xd6   : > { %3097 = vmatprep.subr.bf16.mxu0 %v4936_v14  ;;  %3260 = vmatpush1.bf16.msra.mxu1 %v4931_v24  ;;  %v5576_v12 = vsub.s32 0, %v5573_v11  ;;  %v663_v19 = vsub.s32 1, %v5573_v11 }
  0xd7   : > { %3261 = vmatprep.subr.bf16.mxu1 %v4939_v25 }
  0xd8   : > { %v660_v14 = vrot.slane %v5581_v13, %v5576_v12  ;;  %v664_v15 = vrot.slane %v5581_v13, %v663_v19 }
  0xd9   : > { %3098 = vmatpush1.bf16.msra.mxu0 %v4934_v17 }
  0xda   : > { %3099 = vmatprep.subr.bf16.mxu0 %v4942_v18  ;;  %3262 = vmatpush1.bf16.msra.mxu1 %v4937_v28 }
  0xdb   : > { %3263 = vmatprep.subr.bf16.mxu1 %v4945_v29  ;;  %v5012_v29 = vld [vmem:[#allocation4 + $0x200] ss:$16 sps:$4 sm:$0xff]  }
  0xdd   : > { %3100 = vmatpush1.bf16.msra.mxu0 %v4940_v22 }
  0xde   : > { %3101 = vmatprep.subr.bf16.mxu0 %v4948_v23  ;;  %3264 = vmatpush1.bf16.msra.mxu1 %v4943_v31  ;;  %v5020_v31 = vld [vmem:[#allocation4 + $0x224] ss:$16 sps:$4 sm:$0xff]  }
  0xdf   : > { %3265 = vmatprep.subr.bf16.mxu1 %v4951_v33  ;;  %v5023_v33 = vld [vmem:[#allocation4 + $0x22c] ss:$16 sps:$4 sm:$0xff]  }
  0xe1   : > { %3102 = vmatpush1.bf16.msra.mxu0 %v4946_v26  ;;  %v671_v26 = vsub.s32 3, %v5573_v11 }
  0xe2   : > { %3103 = vmatprep.subr.bf16.mxu0 %v4954_v27  ;;  %3266 = vmatpush1.bf16.msra.mxu1 %v4949_v36  ;;  %v5021_v36 = vld [vmem:[#allocation4 + $0x228] ss:$16 sps:$4 sm:$0xff]  }
  0xe3   : > { %3267 = vmatprep.subr.bf16.mxu1 %v4957_v37 }
  0xe5   : > { %3104 = vmatpush1.bf16.msra.mxu0 %v4952_v3  ;;  %v5015_v3 = vld [vmem:[#allocation4 + $0x208] ss:$16 sps:$4 sm:$0xff]  }
  0xe6   : > { %3105 = vmatprep.subr.bf16.mxu0 %v4960_v30  ;;  %3268 = vmatpush1.bf16.msra.mxu1 %v4955_v40 }
  0xe7   : > { %3269 = vmatprep.subr.bf16.mxu1 %v4963_v41 }
  0xe9   : > { %3106 = vmatpush1.bf16.msra.mxu0 %v4958_v34  ;;  %v672_v34 = vrot.slane %v5581_v13, %v671_v26 }
  0xea   : > { %3107 = vmatprep.subr.bf16.mxu0 %v4966_v35  ;;  %3270 = vmatpush1.bf16.msra.mxu1 %v4961_v44  ;;  %v5018_v35 = vld [vmem:[#allocation4 + $0x220] ss:$16 sps:$4 sm:$0xff]  }
  0xeb   : > { %3271 = vmatprep.subr.bf16.mxu1 %v4969_v45  ;;  %v5027_v45 = vld [vmem:[#allocation4 + $0x248] ss:$16 sps:$4 sm:$0xff]  }
  0xed   : > { %3108 = vmatpush1.bf16.msra.mxu0 %v4964_v38  ;;  %v5026_v38 = vld [vmem:[#allocation4 + $0x244] ss:$16 sps:$4 sm:$0xff]  }
  0xee   : > { %3109 = vmatprep.subr.bf16.mxu0 %v4972_v39  ;;  %3272 = vmatpush1.bf16.msra.mxu1 %v4967_v48  ;;  %v5029_v39 = vld [vmem:[#allocation4 + $0x24c] ss:$16 sps:$4 sm:$0xff]  }
  0xef   : > { %3273 = vmatprep.subr.bf16.mxu1 %v4975_v49  ;;  %v5035_v48 = vld [vmem:[#allocation4 + $0x26c] ss:$16 sps:$4 sm:$0xff]  }
  0xf1   : > { %3110 = vmatpush1.bf16.msra.mxu0 %v4970_v42 }
  0xf2   : > { %3111 = vmatprep.subr.bf16.mxu0 %v4978_v43  ;;  %3274 = vmatpush1.bf16.msra.mxu1 %v4973_v51  ;;  %v5024_v43 = vld [vmem:[#allocation4 + $0x240] ss:$16 sps:$4 sm:$0xff]   ;;  %v5033_v51 = vld [vmem:[#allocation4 + $0x268] ss:$16 sps:$4 sm:$0xff]  }
  0xf3   : > { %3275 = vmatprep.subr.bf16.mxu1 %v4981_v52  ;;  %v5038_v52 = vld [vmem:[#allocation4 + $0x284] ss:$16 sps:$4 sm:$0xff]  }
  0xf5   : > { %3112 = vmatpush1.bf16.msra.mxu0 %v4976_v46 }
  0xf6   : > { %3113 = vmatprep.subr.bf16.mxu0 %v4984_v47  ;;  %3276 = vmatpush1.bf16.msra.mxu1 %v4979_v55  ;;  %v5032_v47 = vld [vmem:[#allocation4 + $0x264] ss:$16 sps:$4 sm:$0xff]   ;;  %v5039_v55 = vld [vmem:[#allocation4 + $0x288] ss:$16 sps:$4 sm:$0xff]  }
  0xf7   : > { %3277 = vmatprep.subr.bf16.mxu1 %v4987_v56  ;;  %v5044_v56 = vld [vmem:[#allocation4 + $0x2a4] ss:$16 sps:$4 sm:$0xff]  }
  0xf9   : > { %3114 = vmatpush1.bf16.msra.mxu0 %v4982_v50 }
  0xfa   : > { %3115 = vmatprep.subr.bf16.mxu0 %v4990_v32  ;;  %3278 = vmatpush1.bf16.msra.mxu1 %v4985_v59  ;;  %v5030_v32 = vld [vmem:[#allocation4 + $0x260] ss:$16 sps:$4 sm:$0xff]   ;;  %v5045_v59 = vld [vmem:[#allocation4 + $0x2a8] ss:$16 sps:$4 sm:$0xff]  }
  0xfb   : > { %3279 = vmatprep.subr.bf16.mxu1 %v4993_v60  ;;  %v5050_v60 = vld [vmem:[#allocation4 + $0x2c4] ss:$16 sps:$4 sm:$0xff]  }
  0xfd   : > { %3116 = vmatpush1.bf16.msra.mxu0 %v4988_v53  ;;  %v5041_v53 = vld [vmem:[#allocation4 + $0x28c] ss:$16 sps:$4 sm:$0xff]  }
  0xfe   : > { %3117 = vmatprep.subr.bf16.mxu0 %v4996_v54  ;;  %3280 = vmatpush1.bf16.msra.mxu1 %v4991_v63  ;;  %v5036_v54 = vld [vmem:[#allocation4 + $0x280] ss:$16 sps:$4 sm:$0xff]   ;;  %v5051_v63 = vld [vmem:[#allocation4 + $0x2c8] ss:$16 sps:$4 sm:$0xff]  }
  0xff   : > { %3281 = vmatprep.subr.bf16.mxu1 %v4999_v0  ;;  %v5056_v0 = vld [vmem:[#allocation4 + $0x2e4] ss:$16 sps:$4 sm:$0xff]  }
 0x101   : > { %3118 = vmatpush1.bf16.msra.mxu0 %v4994_v57  ;;  %v5047_v57 = vld [vmem:[#allocation4 + $0x2ac] ss:$16 sps:$4 sm:$0xff]  }
 0x102   : > { %3119 = vmatprep.subr.bf16.mxu0 %v5002_v58  ;;  %3282 = vmatpush1.bf16.msra.mxu1 %v4997_v4  ;;  %v5042_v58 = vld [vmem:[#allocation4 + $0x2a0] ss:$16 sps:$4 sm:$0xff]   ;;  %v5057_v4 = vld [vmem:[#allocation4 + $0x2e8] ss:$16 sps:$4 sm:$0xff]  }
 0x103   : > { %3283 = vmatprep.subr.bf16.mxu1 %v5005_v5  ;;  %v5062_v5 = vld [vmem:[#allocation4 + $0x304] ss:$16 sps:$4 sm:$0xff]  }
 0x105   : > { %3120 = vmatpush1.bf16.msra.mxu0 %v5000_v61  ;;  %v5053_v61 = vld [vmem:[#allocation4 + $0x2cc] ss:$16 sps:$4 sm:$0xff]  }
 0x106   : > { %3121 = vmatprep.subr.bf16.mxu0 %v5008_v62  ;;  %3284 = vmatpush1.bf16.msra.mxu1 %v5003_v6  ;;  %v5048_v62 = vld [vmem:[#allocation4 + $0x2c0] ss:$16 sps:$4 sm:$0xff]   ;;  %v5065_v6 = vld [vmem:[#allocation4 + $0x30c] ss:$16 sps:$4 sm:$0xff]  }
 0x107   : > { %3285 = vmatprep.subr.bf16.mxu1 %v5011_v7  ;;  %v5060_v7 = vld [vmem:[#allocation4 + $0x300] ss:$16 sps:$4 sm:$0xff]  }
 0x109   : > { %3122 = vmatpush1.bf16.msra.mxu0 %v5006_v1  ;;  %v5059_v1 = vld [vmem:[#allocation4 + $0x2ec] ss:$16 sps:$4 sm:$0xff]  }
 0x10a   : > { %3132 = vmatprep.subr.bf16.mxu0 %v5014_v2  ;;  %3286 = vmatpush1.bf16.msra.mxu1 %v5009_v8  ;;  %v5054_v2 = vld [vmem:[#allocation4 + $0x2e0] ss:$16 sps:$4 sm:$0xff]   ;;  %v5063_v8 = vld [vmem:[#allocation4 + $0x308] ss:$16 sps:$4 sm:$0xff]  }
 0x10b   : > { %3296 = vmatprep.subr.bf16.mxu1 %v5017_v9  ;;  %v5068_v9 = vld [vmem:[#allocation4 + $0x324] ss:$16 sps:$4 sm:$0xff]  }
 0x15f   : > { %v1371_v16 = vpop.f32.mrb[0].mxu0  ;;  %v5593_v37 = vpop.f32.mrb[0].mxu1 }
 0x160   : > { %v1372_v17 = vadd.f32 %v1371_v16, %v660_v14  ;;  %v1373_v18 = vpop.f32.mrb[1].mxu0  ;;  %v1414_v40 = vpop.f32.mrb[1].mxu1  ;;  %v5066_v14 = vld [vmem:[#allocation4 + $0x320] ss:$16 sps:$4 sm:$0xff]   ;;  %v5074_v16 = vld [vmem:[#allocation4 + $0x344] ss:$16 sps:$4 sm:$0xff]  }
 0x161   : > { %v1374_v20 = vadd.f32 %v1373_v18, %v664_v15  ;;  %v1375_v21 = vpop.f32.mrb[2].mxu0  ;;  %v1415_v41 = vadd.f32 %v1414_v40, %v672_v34  ;;  %v1416_v42 = vpop.f32.mrb[2].mxu1  ;;  %v5069_v15 = vld [vmem:[#allocation4 + $0x328] ss:$16 sps:$4 sm:$0xff]   ;;  %v5072_v18 = vld [vmem:[#allocation4 + $0x340] ss:$16 sps:$4 sm:$0xff]  }
 0x162   : > { %vm1501_vm0 = vcmp.gt.f32.partialorder %v1372_v17, 0.0  ;;  %v1509_v22 = vmul.f32 0.01, %v1372_v17  ;;  %v1376_v23 = vpop.f32.mrb[3].mxu0  ;;  %v1417_v44 = vpop.f32.mrb[3].mxu1  ;;  %v679_v34 = vsub.s32 5, %v5573_v11 }
 0x163   : > { %vm1502_vm1 = vcmp.gt.f32.partialorder %v1374_v20, 0.0  ;;  %v1510_v24 = vmul.f32 0.01, %v1374_v20  ;;  %vm1504_vm2 = vcmp.gt.f32.partialorder %v1415_v41, 0.0  ;;  %v1512_v46 = vmul.f32 0.01, %v1415_v41 }
 0x164   : > { %v1517_v25 = vsel %vm1501_vm0, %v1372_v17, %v1509_v22  ;;  %v5077_v17 = vld [vmem:[#allocation4 + $0x34c] ss:$16 sps:$4 sm:$0xff]   ;;  %v5080_v21 = vld [vmem:[#allocation4 + $0x364] ss:$16 sps:$4 sm:$0xff]   ;;  %v5078_v23 = vld [vmem:[#allocation4 + $0x360] ss:$16 sps:$4 sm:$0xff]  }
 0x165   : > { %v1518_v27 = vsel %vm1502_vm1, %v1374_v20, %v1510_v24  ;;  %v1525_v30 = vpack.c.bf16 %v1517_v25, %v1517_v25  ;;  %v1520_v49 = vsel %vm1504_vm2, %v1415_v41, %v1512_v46  ;;  %v5075_v20 = vld [vmem:[#allocation4 + $0x348] ss:$16 sps:$4 sm:$0xff]   ;;  %v5083_v22 = vld [vmem:[#allocation4 + $0x36c] ss:$16 sps:$4 sm:$0xff]   ;;  %v5086_v25 = vld [vmem:[#allocation4 + $0x384] ss:$16 sps:$4 sm:$0xff]   ;;  %v680_v41 = vrot.slane %v5581_v13, %v679_v34 }
 0x166   : > { %v1526_v28 = vpack.c.bf16 %v1518_v27, %v1518_v27  ;;  %v1528_v50 = vpack.c.bf16 %v1520_v49, %v1520_v49  ;;  %v5081_v24 = vld [vmem:[#allocation4 + $0x368] ss:$16 sps:$4 sm:$0xff]   ;;  %v5089_v27 = vld [vmem:[#allocation4 + $0x38c] ss:$16 sps:$4 sm:$0xff]   ;;  %v5096_v42 = vld [vmem:[#allocation4 + $0x3c0] ss:$16 sps:$4 sm:$0xff]  }
 0x167   : > { %v5104_v44 = vld [vmem:[#allocation4 + $0x3e4] ss:$16 sps:$4 sm:$0xff]   ;;  %v5102_v49 = vld [vmem:[#allocation4 + $0x3e0] ss:$16 sps:$4 sm:$0xff]  }
 0x168   : > { %3123 = vmatprep.mubr.bf16.mxu0 %v1526_v28  ;;  %3287 = vmatprep.mubr.bf16.mxu1 %v1526_v28  ;;  %v667_v28 = vsub.s32 2, %v5573_v11  ;;  %v5150_v34 = vld [vmem:[#allocation4 + $0x4e0] ss:$16 sps:$4 sm:$0xff]  }
 0x169   : > { %3124 = vmatmul.mubr.bf16.vlgmr.msra.gmra.mrb[8].mxu0 %v1525_v30  ;;  %3288 = vmatmul.mubr.bf16.vlgmr.msra.gmra.mrb[8].mxu1 %v1525_v30  ;;  %v5092_v30 = vld [vmem:[#allocation4 + $0x3a4] ss:$16 sps:$4 sm:$0xff]  }
 0x16a   : > { %3133 = vmatpush1.bf16.msra.mxu0 %v5012_v29  ;;  %3297 = vmatpush1.bf16.msra.mxu1 %v5015_v3  ;;  %v5084_v29 = vld [vmem:[#allocation4 + $0x380] ss:$16 sps:$4 sm:$0xff]   ;;  %v5087_v3 = vld [vmem:[#allocation4 + $0x388] ss:$16 sps:$4 sm:$0xff]  }
 0x16b   : > { %3134 = vmatprep.subr.bf16.mxu0 %v5020_v31  ;;  %3298 = vmatprep.subr.bf16.mxu1 %v5023_v33  ;;  %v5095_v31 = vld [vmem:[#allocation4 + $0x3ac] ss:$16 sps:$4 sm:$0xff]   ;;  %v668_v33 = vrot.slane %v5581_v13, %v667_v28 }
 0x16c   : > { %3164 = vmatprep.mubr.bf16.mxu0 %v1528_v50  ;;  %3328 = vmatprep.mubr.bf16.mxu1 %v1528_v50 }
 0x16d   : > { %v1413_v40 = vadd.f32 %v5593_v37, %v668_v33  ;;  %v5105_v37 = vld [vmem:[#allocation4 + $0x3e8] ss:$16 sps:$4 sm:$0xff]   ;;  %v5155_v33 = vld [vmem:[#allocation4 + $0x4ec] ss:$16 sps:$4 sm:$0xff]  }
 0x16e   : > { %3135 = vmatpush1.bf16.msra.mxu0 %v5018_v35  ;;  %3299 = vmatpush1.bf16.msra.mxu1 %v5021_v36  ;;  %v5090_v35 = vld [vmem:[#allocation4 + $0x3a0] ss:$16 sps:$4 sm:$0xff]   ;;  %v5093_v36 = vld [vmem:[#allocation4 + $0x3a8] ss:$16 sps:$4 sm:$0xff]  }
 0x16f   : > { %3136 = vmatprep.subr.bf16.mxu0 %v5026_v38  ;;  %3300 = vmatprep.subr.bf16.mxu1 %v5029_v39  ;;  %v5098_v38 = vld [vmem:[#allocation4 + $0x3c4] ss:$16 sps:$4 sm:$0xff]   ;;  %v5101_v39 = vld [vmem:[#allocation4 + $0x3cc] ss:$16 sps:$4 sm:$0xff]   ;;  %vm1503_vm3 = vcmp.gt.f32.partialorder %v1413_v40, 0.0 }
 0x172   : > { %3137 = vmatpush1.bf16.msra.mxu0 %v5024_v43  ;;  %3301 = vmatpush1.bf16.msra.mxu1 %v5027_v45  ;;  %v5099_v43 = vld [vmem:[#allocation4 + $0x3c8] ss:$16 sps:$4 sm:$0xff]   ;;  %v5107_v45 = vld [vmem:[#allocation4 + $0x3ec] ss:$16 sps:$4 sm:$0xff]  }
 0x173   : > { %3138 = vmatprep.subr.bf16.mxu0 %v5032_v47  ;;  %3302 = vmatprep.subr.bf16.mxu1 %v5035_v48  ;;  %v1511_v47 = vmul.f32 0.01, %v1413_v40 }
 0x176   : > { %3139 = vmatpush1.bf16.msra.mxu0 %v5030_v32  ;;  %3303 = vmatpush1.bf16.msra.mxu1 %v5033_v51  ;;  %v5110_v51 = vld [vmem:[#allocation4 + $0x404] ss:$16 sps:$4 sm:$0xff]  }
 0x177   : > { %3140 = vmatprep.subr.bf16.mxu0 %v5038_v52  ;;  %3304 = vmatprep.subr.bf16.mxu1 %v5041_v53  ;;  %v5113_v53 = vld [vmem:[#allocation4 + $0x40c] ss:$16 sps:$4 sm:$0xff]  }
 0x17a   : > { %3141 = vmatpush1.bf16.msra.mxu0 %v5036_v54  ;;  %3305 = vmatpush1.bf16.msra.mxu1 %v5039_v55  ;;  %v1519_v55 = vsel %vm1503_vm3, %v1413_v40, %v1511_v47  ;;  %v5159_v40 = vld [vmem:[#allocation4 + $0x508] ss:$16 sps:$4 sm:$0xff]   ;;  %v5173_v47 = vld [vmem:[#allocation4 + $0x54c] ss:$16 sps:$4 sm:$0xff]  }
 0x17b   : > { %3142 = vmatprep.subr.bf16.mxu0 %v5044_v56  ;;  %3306 = vmatprep.subr.bf16.mxu1 %v5047_v57  ;;  %v5108_v57 = vld [vmem:[#allocation4 + $0x400] ss:$16 sps:$4 sm:$0xff]  }
 0x17e   : > { %3143 = vmatpush1.bf16.msra.mxu0 %v5042_v58  ;;  %3307 = vmatpush1.bf16.msra.mxu1 %v5045_v59  ;;  %v5111_v58 = vld [vmem:[#allocation4 + $0x408] ss:$16 sps:$4 sm:$0xff]   ;;  %v1527_v59 = vpack.c.bf16 %v1519_v55, %v1519_v55  ;;  %v687_v55 = vsub.s32 7, %v5573_v11 }
 0x17f   : > { %3144 = vmatprep.subr.bf16.mxu0 %v5050_v60  ;;  %3308 = vmatprep.subr.bf16.mxu1 %v5053_v61  ;;  %v5116_v60 = vld [vmem:[#allocation4 + $0x424] ss:$16 sps:$4 sm:$0xff]   ;;  %v5119_v61 = vld [vmem:[#allocation4 + $0x42c] ss:$16 sps:$4 sm:$0xff]  }
 0x182   : > { %3145 = vmatpush1.bf16.msra.mxu0 %v5048_v62  ;;  %3309 = vmatpush1.bf16.msra.mxu1 %v5051_v63  ;;  %v5114_v63 = vld [vmem:[#allocation4 + $0x420] ss:$16 sps:$4 sm:$0xff]  }
 0x183   : > { %3146 = vmatprep.subr.bf16.mxu0 %v5056_v0  ;;  %3310 = vmatprep.subr.bf16.mxu1 %v5059_v1  ;;  %v5117_v0 = vld [vmem:[#allocation4 + $0x428] ss:$16 sps:$4 sm:$0xff]  }
 0x186   : > { %3147 = vmatpush1.bf16.msra.mxu0 %v5054_v2  ;;  %3311 = vmatpush1.bf16.msra.mxu1 %v5057_v4  ;;  %v5122_v2 = vld [vmem:[#allocation4 + $0x444] ss:$16 sps:$4 sm:$0xff]   ;;  %v5125_v4 = vld [vmem:[#allocation4 + $0x44c] ss:$16 sps:$4 sm:$0xff]  }
 0x187   : > { %3148 = vmatprep.subr.bf16.mxu0 %v5062_v5  ;;  %3312 = vmatprep.subr.bf16.mxu1 %v5065_v6 }
 0x18a   : > { %3149 = vmatpush1.bf16.msra.mxu0 %v5060_v7  ;;  %3313 = vmatpush1.bf16.msra.mxu1 %v5063_v8  ;;  %v5120_v8 = vld [vmem:[#allocation4 + $0x440] ss:$16 sps:$4 sm:$0xff]  }
 0x18b   : > { %3150 = vmatprep.subr.bf16.mxu0 %v5068_v9  ;;  %3314 = vmatprep.subr.bf16.mxu1 %v5071_v10  ;;  %v5123_v9 = vld [vmem:[#allocation4 + $0x448] ss:$16 sps:$4 sm:$0xff]   ;;  %v5128_v10 = vld [vmem:[#allocation4 + $0x464] ss:$16 sps:$4 sm:$0xff]  }
 0x18e   : > { %3151 = vmatpush1.bf16.msra.mxu0 %v5066_v14  ;;  %3315 = vmatpush1.bf16.msra.mxu1 %v5069_v15  ;;  %v5131_v14 = vld [vmem:[#allocation4 + $0x46c] ss:$16 sps:$4 sm:$0xff]   ;;  %v5126_v15 = vld [vmem:[#allocation4 + $0x460] ss:$16 sps:$4 sm:$0xff]  }
 0x18f   : > { %3152 = vmatprep.subr.bf16.mxu0 %v5074_v16  ;;  %3316 = vmatprep.subr.bf16.mxu1 %v5077_v17  ;;  %v5129_v16 = vld [vmem:[#allocation4 + $0x468] ss:$16 sps:$4 sm:$0xff]   ;;  %v5134_v17 = vld [vmem:[#allocation4 + $0x484] ss:$16 sps:$4 sm:$0xff]  }
 0x192   : > { %3153 = vmatpush1.bf16.msra.mxu0 %v5072_v18  ;;  %3317 = vmatpush1.bf16.msra.mxu1 %v5075_v20  ;;  %v5137_v18 = vld [vmem:[#allocation4 + $0x48c] ss:$16 sps:$4 sm:$0xff]   ;;  %v5132_v20 = vld [vmem:[#allocation4 + $0x480] ss:$16 sps:$4 sm:$0xff]  }
 0x193   : > { %3154 = vmatprep.subr.bf16.mxu0 %v5080_v21  ;;  %3318 = vmatprep.subr.bf16.mxu1 %v5083_v22  ;;  %v5135_v21 = vld [vmem:[#allocation4 + $0x488] ss:$16 sps:$4 sm:$0xff]   ;;  %v5140_v22 = vld [vmem:[#allocation4 + $0x4a4] ss:$16 sps:$4 sm:$0xff]  }
 0x196   : > { %3155 = vmatpush1.bf16.msra.mxu0 %v5078_v23  ;;  %3319 = vmatpush1.bf16.msra.mxu1 %v5081_v24  ;;  %v5143_v23 = vld [vmem:[#allocation4 + $0x4ac] ss:$16 sps:$4 sm:$0xff]   ;;  %v5138_v24 = vld [vmem:[#allocation4 + $0x4a0] ss:$16 sps:$4 sm:$0xff]  }
 0x197   : > { %3156 = vmatprep.subr.bf16.mxu0 %v5086_v25  ;;  %3320 = vmatprep.subr.bf16.mxu1 %v5089_v27  ;;  %v5141_v25 = vld [vmem:[#allocation4 + $0x4a8] ss:$16 sps:$4 sm:$0xff]   ;;  %v5146_v27 = vld [vmem:[#allocation4 + $0x4c4] ss:$16 sps:$4 sm:$0xff]  }
 0x19a   : > { %3157 = vmatpush1.bf16.msra.mxu0 %v5084_v29  ;;  %3321 = vmatpush1.bf16.msra.mxu1 %v5087_v3  ;;  %v5149_v29 = vld [vmem:[#allocation4 + $0x4cc] ss:$16 sps:$4 sm:$0xff]   ;;  %v5144_v3 = vld [vmem:[#allocation4 + $0x4c0] ss:$16 sps:$4 sm:$0xff]  }
 0x19b   : > { %3158 = vmatprep.subr.bf16.mxu0 %v5092_v30  ;;  %3322 = vmatprep.subr.bf16.mxu1 %v5095_v31  ;;  %v5147_v30 = vld [vmem:[#allocation4 + $0x4c8] ss:$16 sps:$4 sm:$0xff]   ;;  %v5152_v31 = vld [vmem:[#allocation4 + $0x4e4] ss:$16 sps:$4 sm:$0xff]  }
 0x19e   : > { %3159 = vmatpush1.bf16.msra.mxu0 %v5090_v35  ;;  %3323 = vmatpush1.bf16.msra.mxu1 %v5093_v36  ;;  %v5153_v35 = vld [vmem:[#allocation4 + $0x4e8] ss:$16 sps:$4 sm:$0xff]   ;;  %v5158_v36 = vld [vmem:[#allocation4 + $0x504] ss:$16 sps:$4 sm:$0xff]  }
 0x19f   : > { %3160 = vmatprep.subr.bf16.mxu0 %v5098_v38  ;;  %3324 = vmatprep.subr.bf16.mxu1 %v5101_v39  ;;  %v5602_v46 = vpop.f32.mrb[4].mxu0  ;;  %v5161_v38 = vld [vmem:[#allocation4 + $0x50c] ss:$16 sps:$4 sm:$0xff]   ;;  %v5156_v39 = vld [vmem:[#allocation4 + $0x500] ss:$16 sps:$4 sm:$0xff]  }
 0x1a0   : > { %v1455_v48 = vpop.f32.mrb[5].mxu0  ;;  %v5604_v1 = vpop.f32.mrb[4].mxu1 }
 0x1a1   : > { %v1456_v50 = vadd.f32 %v1455_v48, %v680_v41  ;;  %v1457_v32 = vpop.f32.mrb[6].mxu0  ;;  %v5606_v5 = vpop.f32.mrb[5].mxu1  ;;  %v5164_v41 = vld [vmem:[#allocation4 + $0x524] ss:$16 sps:$4 sm:$0xff]   ;;  %v5168_v48 = vld [vmem:[#allocation4 + $0x540] ss:$16 sps:$4 sm:$0xff]  }
 0x1a2   : > { %3161 = vmatpush1.bf16.msra.mxu0 %v5096_v42  ;;  %3325 = vmatpush1.bf16.msra.mxu1 %v5099_v43  ;;  %v1458_v52 = vpop.f32.mrb[7].mxu0  ;;  %v1498_v6 = vpop.f32.mrb[6].mxu1  ;;  %v5167_v42 = vld [vmem:[#allocation4 + $0x52c] ss:$16 sps:$4 sm:$0xff]   ;;  %v5162_v43 = vld [vmem:[#allocation4 + $0x520] ss:$16 sps:$4 sm:$0xff]  }
 0x1a3   : > { %3162 = vmatprep.subr.bf16.mxu0 %v5104_v44  ;;  %3326 = vmatprep.subr.bf16.mxu1 %v5107_v45  ;;  %vm1506_vm4 = vcmp.gt.f32.partialorder %v1456_v50, 0.0  ;;  %v1514_v54 = vmul.f32 0.01, %v1456_v50  ;;  %v1499_v7 = vpop.f32.mrb[7].mxu1  ;;  %v5165_v44 = vld [vmem:[#allocation4 + $0x528] ss:$16 sps:$4 sm:$0xff]  }
 0x1a4   : > { %v5170_v45 = vld [vmem:[#allocation4 + $0x544] ss:$16 sps:$4 sm:$0xff]   ;;  %v5179_v32 = vld [vmem:[#allocation4 + $0x56c] ss:$16 sps:$4 sm:$0xff]   ;;  %v5192_v7 = vld [vmem:[#allocation4 + $0x5c0] ss:$16 sps:$4 sm:$0xff]  }
 0x1a5   : > { %v1522_v56 = vsel %vm1506_vm4, %v1456_v50, %v1514_v54  ;;  %v5176_v50 = vld [vmem:[#allocation4 + $0x564] ss:$16 sps:$4 sm:$0xff]   ;;  %v675_v54 = vsub.s32 4, %v5573_v11 }
 0x1a6   : > { %3163 = vmatpush1.bf16.msra.mxu0 %v5102_v49  ;;  %3327 = vmatpush1.bf16.msra.mxu1 %v5105_v37  ;;  %v1530_v62 = vpack.c.bf16 %v1522_v56, %v1522_v56  ;;  %v5171_v49 = vld [vmem:[#allocation4 + $0x548] ss:$16 sps:$4 sm:$0xff]   ;;  %v5174_v37 = vld [vmem:[#allocation4 + $0x560] ss:$16 sps:$4 sm:$0xff]   ;;  %v5182_v52 = vld [vmem:[#allocation4 + $0x584] ss:$16 sps:$4 sm:$0xff]  }
 0x1a7   : > { %3173 = vmatprep.subr.bf16.mxu0 %v5110_v51  ;;  %3337 = vmatprep.subr.bf16.mxu1 %v5113_v53  ;;  %v5177_v51 = vld [vmem:[#allocation4 + $0x568] ss:$16 sps:$4 sm:$0xff]   ;;  %v5185_v53 = vld [vmem:[#allocation4 + $0x58c] ss:$16 sps:$4 sm:$0xff]   ;;  %v5180_v56 = vld [vmem:[#allocation4 + $0x580] ss:$16 sps:$4 sm:$0xff]  }
 0x1a9   : > { %3165 = vmatmul.mubr.bf16.vlgmr.msra.gmra.mrb[8].mxu0 %v1527_v59  ;;  %3329 = vmatmul.mubr.bf16.vlgmr.msra.gmra.mrb[8].mxu1 %v1527_v59  ;;  %v5191_v59 = vld [vmem:[#allocation4 + $0x5ac] ss:$16 sps:$4 sm:$0xff]  }
 0x1aa   : > { %3174 = vmatpush1.bf16.msra.mxu0 %v5108_v57  ;;  %3338 = vmatpush1.bf16.msra.mxu1 %v5111_v58  ;;  %v5183_v57 = vld [vmem:[#allocation4 + $0x588] ss:$16 sps:$4 sm:$0xff]   ;;  %v5188_v58 = vld [vmem:[#allocation4 + $0x5a4] ss:$16 sps:$4 sm:$0xff]  }
 0x1ab   : > { %3175 = vmatprep.subr.bf16.mxu0 %v5116_v60  ;;  %3339 = vmatprep.subr.bf16.mxu1 %v5119_v61  ;;  %v676_v60 = vrot.slane %v5581_v13, %v675_v54  ;;  %v688_v61 = vrot.slane %v5581_v13, %v687_v55  ;;  %v5249_v54 = vld [vmem:[#allocation4 + $0x6e8] ss:$16 sps:$4 sm:$0xff]   ;;  %v5254_v55 = vld [vmem:[#allocation4 + $0x704] ss:$16 sps:$4 sm:$0xff]  }
 0x1ac   : > { %3205 = vmatprep.mubr.bf16.mxu0 %v1530_v62  ;;  %3369 = vmatprep.mubr.bf16.mxu1 %v1530_v62  ;;  %v5186_v62 = vld [vmem:[#allocation4 + $0x5a0] ss:$16 sps:$4 sm:$0xff]  }
 0x1ad   : > { %v1497_v6 = vadd.f32 %v5606_v5, %v688_v61  ;;  %v5209_v5 = vld [vmem:[#allocation4 + $0x60c] ss:$16 sps:$4 sm:$0xff]   ;;  %v5258_v61 = vld [vmem:[#allocation4 + $0x720] ss:$16 sps:$4 sm:$0xff]  }
 0x1ae   : > { %3176 = vmatpush1.bf16.msra.mxu0 %v5114_v63  ;;  %3340 = vmatpush1.bf16.msra.mxu1 %v5117_v0  ;;  %v5189_v63 = vld [vmem:[#allocation4 + $0x5a8] ss:$16 sps:$4 sm:$0xff]   ;;  %v5194_v0 = vld [vmem:[#allocation4 + $0x5c4] ss:$16 sps:$4 sm:$0xff]  }
 0x1af   : > { %3177 = vmatprep.subr.bf16.mxu0 %v5122_v2  ;;  %3341 = vmatprep.subr.bf16.mxu1 %v5125_v4  ;;  %v5197_v2 = vld [vmem:[#allocation4 + $0x5cc] ss:$16 sps:$4 sm:$0xff]   ;;  %v1454_v4 = vadd.f32 %v5602_v46, %v676_v60  ;;  %vm1508_vm6 = vcmp.gt.f32.partialorder %v1497_v6, 0.0  ;;  %v5206_v46 = vld [vmem:[#allocation4 + $0x604] ss:$16 sps:$4 sm:$0xff]  }
 0x1b0   : > { %v5263_v60 = vld [vmem:[#allocation4 + $0x72c] ss:$16 sps:$4 sm:$0xff]  }
 0x1b1   : > { %vm1505_vm5 = vcmp.gt.f32.partialorder %v1454_v4, 0.0 }
 0x1b2   : > { %3178 = vmatpush1.bf16.msra.mxu0 %v5120_v8  ;;  %3342 = vmatpush1.bf16.msra.mxu1 %v5123_v9  ;;  %v5195_v8 = vld [vmem:[#allocation4 + $0x5c8] ss:$16 sps:$4 sm:$0xff]   ;;  %v5200_v9 = vld [vmem:[#allocation4 + $0x5e4] ss:$16 sps:$4 sm:$0xff]  }
 0x1b3   : > { %3179 = vmatprep.subr.bf16.mxu0 %v5128_v10  ;;  %3343 = vmatprep.subr.bf16.mxu1 %v5131_v14  ;;  %v5203_v10 = vld [vmem:[#allocation4 + $0x5ec] ss:$16 sps:$4 sm:$0xff]   ;;  %v1513_v14 = vmul.f32 0.01, %v1454_v4 }
 0x1b6   : > { %3180 = vmatpush1.bf16.msra.mxu0 %v5126_v15  ;;  %3344 = vmatpush1.bf16.msra.mxu1 %v5129_v16  ;;  %v1516_v15 = vmul.f32 0.01, %v1497_v6  ;;  %v5198_v16 = vld [vmem:[#allocation4 + $0x5e0] ss:$16 sps:$4 sm:$0xff]  }
 0x1b7   : > { %3181 = vmatprep.subr.bf16.mxu0 %v5134_v17  ;;  %3345 = vmatprep.subr.bf16.mxu1 %v5137_v18  ;;  %v5201_v17 = vld [vmem:[#allocation4 + $0x5e8] ss:$16 sps:$4 sm:$0xff]   ;;  %v1521_v18 = vsel %vm1505_vm5, %v1454_v4, %v1513_v14  ;;  %v5281_v14 = vld [vmem:[#allocation4 + $0x78c] ss:$16 sps:$4 sm:$0xff]  }
 0x1b8   : > { %v5267_v4 = vld [vmem:[#allocation4 + $0x748] ss:$16 sps:$4 sm:$0xff]  }
 0x1ba   : > { %3182 = vmatpush1.bf16.msra.mxu0 %v5132_v20  ;;  %3346 = vmatpush1.bf16.msra.mxu1 %v5135_v21  ;;  %v1524_v20 = vsel %vm1508_vm6, %v1497_v6, %v1516_v15  ;;  %v5204_v21 = vld [vmem:[#allocation4 + $0x600] ss:$16 sps:$4 sm:$0xff]   ;;  %v5272_v6 = vld [vmem:[#allocation4 + $0x764] ss:$16 sps:$4 sm:$0xff]   ;;  %v683_v15 = vsub.s32 6, %v5573_v11 }
 0x1bb   : > { %3183 = vmatprep.subr.bf16.mxu0 %v5140_v22  ;;  %3347 = vmatprep.subr.bf16.mxu1 %v5143_v23  ;;  %v5207_v22 = vld [vmem:[#allocation4 + $0x608] ss:$16 sps:$4 sm:$0xff]   ;;  %v1529_v23 = vpack.c.bf16 %v1521_v18, %v1521_v18 }
 0x1bc   : > { %v684_v18 = vrot.slane %v5581_v13, %v683_v15  ;;  %v3447_v13 = vld [vmem:[%s5929_s6 + $0x80] sm:$0xff] }
 0x1be   : > { %3184 = vmatpush1.bf16.msra.mxu0 %v5138_v24  ;;  %3348 = vmatpush1.bf16.msra.mxu1 %v5141_v25  ;;  %v5212_v24 = vld [vmem:[#allocation4 + $0x624] ss:$16 sps:$4 sm:$0xff]   ;;  %v5215_v25 = vld [vmem:[#allocation4 + $0x62c] ss:$16 sps:$4 sm:$0xff]  }
 0x1bf   : > { %3185 = vmatprep.subr.bf16.mxu0 %v5146_v27  ;;  %3349 = vmatprep.subr.bf16.mxu1 %v5149_v29  ;;  %v1532_v27 = vpack.c.bf16 %v1524_v20, %v1524_v20  ;;  %v5210_v29 = vld [vmem:[#allocation4 + $0x620] ss:$16 sps:$4 sm:$0xff]  }
 0x1c0   : > { %v5282_v20 = vld [vmem:[#allocation4 + $0x7a0] ss:$16 sps:$4 sm:$0xff]  }
 0x1c2   : > { %3186 = vmatpush1.bf16.msra.mxu0 %v5144_v3  ;;  %3350 = vmatpush1.bf16.msra.mxu1 %v5147_v30  ;;  %v5213_v3 = vld [vmem:[#allocation4 + $0x628] ss:$16 sps:$4 sm:$0xff]   ;;  %v5218_v30 = vld [vmem:[#allocation4 + $0x644] ss:$16 sps:$4 sm:$0xff]  }
 0x1c3   : > { %3187 = vmatprep.subr.bf16.mxu0 %v5152_v31  ;;  %3351 = vmatprep.subr.bf16.mxu1 %v5155_v33  ;;  %v5221_v31 = vld [vmem:[#allocation4 + $0x64c] ss:$16 sps:$4 sm:$0xff]   ;;  %v5216_v33 = vld [vmem:[#allocation4 + $0x640] ss:$16 sps:$4 sm:$0xff]  }
 0x1c6   : > { %3188 = vmatpush1.bf16.msra.mxu0 %v5150_v34  ;;  %3352 = vmatpush1.bf16.msra.mxu1 %v5153_v35  ;;  %v5219_v34 = vld [vmem:[#allocation4 + $0x648] ss:$16 sps:$4 sm:$0xff]   ;;  %v5224_v35 = vld [vmem:[#allocation4 + $0x664] ss:$16 sps:$4 sm:$0xff]  }
 0x1c7   : > { %3189 = vmatprep.subr.bf16.mxu0 %v5158_v36  ;;  %3353 = vmatprep.subr.bf16.mxu1 %v5161_v38  ;;  %v5227_v36 = vld [vmem:[#allocation4 + $0x66c] ss:$16 sps:$4 sm:$0xff]   ;;  %v5222_v38 = vld [vmem:[#allocation4 + $0x660] ss:$16 sps:$4 sm:$0xff]  }
 0x1ca   : > { %3190 = vmatpush1.bf16.msra.mxu0 %v5156_v39  ;;  %3354 = vmatpush1.bf16.msra.mxu1 %v5159_v40  ;;  %v5225_v39 = vld [vmem:[#allocation4 + $0x668] ss:$16 sps:$4 sm:$0xff]   ;;  %v5230_v40 = vld [vmem:[#allocation4 + $0x684] ss:$16 sps:$4 sm:$0xff]  }
 0x1cb   : > { %3191 = vmatprep.subr.bf16.mxu0 %v5164_v41  ;;  %3355 = vmatprep.subr.bf16.mxu1 %v5167_v42  ;;  %v5233_v41 = vld [vmem:[#allocation4 + $0x68c] ss:$16 sps:$4 sm:$0xff]   ;;  %v5228_v42 = vld [vmem:[#allocation4 + $0x680] ss:$16 sps:$4 sm:$0xff]  }
 0x1ce   : > { %3192 = vmatpush1.bf16.msra.mxu0 %v5162_v43  ;;  %3356 = vmatpush1.bf16.msra.mxu1 %v5165_v44  ;;  %v5231_v43 = vld [vmem:[#allocation4 + $0x688] ss:$16 sps:$4 sm:$0xff]   ;;  %v5236_v44 = vld [vmem:[#allocation4 + $0x6a4] ss:$16 sps:$4 sm:$0xff]  }
 0x1cf   : > { %3193 = vmatprep.subr.bf16.mxu0 %v5170_v45  ;;  %3357 = vmatprep.subr.bf16.mxu1 %v5173_v47  ;;  %v5239_v45 = vld [vmem:[#allocation4 + $0x6ac] ss:$16 sps:$4 sm:$0xff]   ;;  %v5234_v47 = vld [vmem:[#allocation4 + $0x6a0] ss:$16 sps:$4 sm:$0xff]  }
 0x1d2   : > { %3194 = vmatpush1.bf16.msra.mxu0 %v5168_v48  ;;  %3358 = vmatpush1.bf16.msra.mxu1 %v5171_v49  ;;  %v5237_v48 = vld [vmem:[#allocation4 + $0x6a8] ss:$16 sps:$4 sm:$0xff]   ;;  %v5242_v49 = vld [vmem:[#allocation4 + $0x6c4] ss:$16 sps:$4 sm:$0xff]  }
 0x1d3   : > { %3195 = vmatprep.subr.bf16.mxu0 %v5176_v50  ;;  %3359 = vmatprep.subr.bf16.mxu1 %v5179_v32  ;;  %v5245_v50 = vld [vmem:[#allocation4 + $0x6cc] ss:$16 sps:$4 sm:$0xff]   ;;  %v5240_v32 = vld [vmem:[#allocation4 + $0x6c0] ss:$16 sps:$4 sm:$0xff]  }
 0x1d6   : > { %3196 = vmatpush1.bf16.msra.mxu0 %v5174_v37  ;;  %3360 = vmatpush1.bf16.msra.mxu1 %v5177_v51  ;;  %v5243_v37 = vld [vmem:[#allocation4 + $0x6c8] ss:$16 sps:$4 sm:$0xff]   ;;  %v5248_v51 = vld [vmem:[#allocation4 + $0x6e4] ss:$16 sps:$4 sm:$0xff]  }
 0x1d7   : > { %3197 = vmatprep.subr.bf16.mxu0 %v5182_v52  ;;  %3361 = vmatprep.subr.bf16.mxu1 %v5185_v53  ;;  %v5251_v52 = vld [vmem:[#allocation4 + $0x6ec] ss:$16 sps:$4 sm:$0xff]   ;;  %v5246_v53 = vld [vmem:[#allocation4 + $0x6e0] ss:$16 sps:$4 sm:$0xff]  }
 0x1da   : > { %3198 = vmatpush1.bf16.msra.mxu0 %v5180_v56  ;;  %3362 = vmatpush1.bf16.msra.mxu1 %v5183_v57  ;;  %v5257_v56 = vld [vmem:[#allocation4 + $0x70c] ss:$16 sps:$4 sm:$0xff]   ;;  %v5252_v57 = vld [vmem:[#allocation4 + $0x700] ss:$16 sps:$4 sm:$0xff]  }
 0x1db   : > { %3199 = vmatprep.subr.bf16.mxu0 %v5188_v58  ;;  %3363 = vmatprep.subr.bf16.mxu1 %v5191_v59  ;;  %v5255_v58 = vld [vmem:[#allocation4 + $0x708] ss:$16 sps:$4 sm:$0xff]   ;;  %v5260_v59 = vld [vmem:[#allocation4 + $0x724] ss:$16 sps:$4 sm:$0xff]  }
 0x1de   : > { %3200 = vmatpush1.bf16.msra.mxu0 %v5186_v62  ;;  %3364 = vmatpush1.bf16.msra.mxu1 %v5189_v63  ;;  %v5261_v62 = vld [vmem:[#allocation4 + $0x728] ss:$16 sps:$4 sm:$0xff]   ;;  %v5266_v63 = vld [vmem:[#allocation4 + $0x744] ss:$16 sps:$4 sm:$0xff]  }
 0x1df   : > { %3201 = vmatprep.subr.bf16.mxu0 %v5194_v0  ;;  %3365 = vmatprep.subr.bf16.mxu1 %v5197_v2  ;;  %v5269_v0 = vld [vmem:[#allocation4 + $0x74c] ss:$16 sps:$4 sm:$0xff]   ;;  %v5264_v2 = vld [vmem:[#allocation4 + $0x740] ss:$16 sps:$4 sm:$0xff]  }
 0x1e2   : > { %3202 = vmatpush1.bf16.msra.mxu0 %v5192_v7  ;;  %3366 = vmatpush1.bf16.msra.mxu1 %v5195_v8  ;;  %v5275_v7 = vld [vmem:[#allocation4 + $0x76c] ss:$16 sps:$4 sm:$0xff]   ;;  %v5270_v8 = vld [vmem:[#allocation4 + $0x760] ss:$16 sps:$4 sm:$0xff]  }
 0x1e3   : > { %3203 = vmatprep.subr.bf16.mxu0 %v5200_v9  ;;  %3367 = vmatprep.subr.bf16.mxu1 %v5203_v10  ;;  %v5273_v9 = vld [vmem:[#allocation4 + $0x768] ss:$16 sps:$4 sm:$0xff]   ;;  %v5278_v10 = vld [vmem:[#allocation4 + $0x784] ss:$16 sps:$4 sm:$0xff]  }
 0x1e6   : > { %3204 = vmatpush1.bf16.msra.mxu0 %v5198_v16  ;;  %3368 = vmatpush1.bf16.msra.mxu1 %v5201_v17  ;;  %v5276_v16 = vld [vmem:[#allocation4 + $0x780] ss:$16 sps:$4 sm:$0xff]   ;;  %v5279_v17 = vld [vmem:[#allocation4 + $0x788] ss:$16 sps:$4 sm:$0xff]  }
 0x1e7   : > { %3214 = vmatprep.subr.bf16.mxu0 %v5206_v46  ;;  %3378 = vmatprep.subr.bf16.mxu1 %v5209_v5  ;;  %v5284_v46 = vld [vmem:[#allocation4 + $0x7a4] ss:$16 sps:$4 sm:$0xff]   ;;  %v5287_v5 = vld [vmem:[#allocation4 + $0x7ac] ss:$16 sps:$4 sm:$0xff]  }
 0x1e9   : > { %3206 = vmatmul.mubr.bf16.vlgmr.msra.gmra.mrb[8].mxu0 %v1529_v23  ;;  %3370 = vmatmul.mubr.bf16.vlgmr.msra.gmra.mrb[8].mxu1 %v1529_v23  ;;  %v5293_v23 = vld [vmem:[#allocation4 + $0x7cc] ss:$16 sps:$4 sm:$0xff]  }
 0x1ea   : > { %3215 = vmatpush1.bf16.msra.mxu0 %v5204_v21  ;;  %3379 = vmatpush1.bf16.msra.mxu1 %v5207_v22  ;;  %v5285_v21 = vld [vmem:[#allocation4 + $0x7a8] ss:$16 sps:$4 sm:$0xff]   ;;  %v5290_v22 = vld [vmem:[#allocation4 + $0x7c4] ss:$16 sps:$4 sm:$0xff]  }
 0x1eb   : > { %3216 = vmatprep.subr.bf16.mxu0 %v5212_v24  ;;  %3380 = vmatprep.subr.bf16.mxu1 %v5215_v25  ;;  %v1495_v24 = vadd.f32 %v5604_v1, %v684_v18  ;;  %v5288_v25 = vld [vmem:[#allocation4 + $0x7c0] ss:$16 sps:$4 sm:$0xff]  }
 0x1ec   : > { %3246 = vmatprep.mubr.bf16.mxu0 %v1532_v27  ;;  %3410 = vmatprep.mubr.bf16.mxu1 %v1532_v27  ;;  %v5291_v27 = vld [vmem:[#allocation4 + $0x7c8] ss:$16 sps:$4 sm:$0xff]   ;;  %v3479_v1 = vld [vmem:[%s5929_s6 + $0x180] sm:$0xff]  ;;  %v3469_v18 = vld [vmem:[%s5929_s6 + $0x130] sm:$0xff] }
 0x1ed   : > { %vm1507_vm7 = vcmp.gt.f32.partialorder %v1495_v24, 0.0 }
 0x1ee   : > { %3217 = vmatpush1.bf16.msra.mxu0 %v5210_v29  ;;  %3381 = vmatpush1.bf16.msra.mxu1 %v5213_v3  ;;  %v5296_v29 = vld [vmem:[#allocation4 + $0x7e4] ss:$16 sps:$4 sm:$0xff]   ;;  %v5299_v3 = vld [vmem:[#allocation4 + $0x7ec] ss:$16 sps:$4 sm:$0xff]  }
 0x1ef   : > { %3218 = vmatprep.subr.bf16.mxu0 %v5218_v30  ;;  %3382 = vmatprep.subr.bf16.mxu1 %v5221_v31  ;;  %v1515_v30 = vmul.f32 0.01, %v1495_v24  ;;  %v3448_v31 = vld [vmem:[%s5929_s6 + $0x88] sm:$0xff] }
 0x1f2   : > { %3219 = vmatpush1.bf16.msra.mxu0 %v5216_v33  ;;  %3383 = vmatpush1.bf16.msra.mxu1 %v5219_v34  ;;  %v3480_v33 = vld [vmem:[%s5929_s6 + $0x188] sm:$0xff]  ;;  %v5294_v34 = vld [vmem:[#allocation4 + $0x7e0] ss:$16 sps:$4 sm:$0xff]  }
 0x1f3   : > { %3220 = vmatprep.subr.bf16.mxu0 %v5224_v35  ;;  %3384 = vmatprep.subr.bf16.mxu1 %v5227_v36  ;;  %v5297_v35 = vld [vmem:[#allocation4 + $0x7e8] ss:$16 sps:$4 sm:$0xff]   ;;  %v3431_v36 = vld [vmem:[%s5929_s6] sm:$0xff] }
 0x1f6   : > { %3221 = vmatpush1.bf16.msra.mxu0 %v5222_v38  ;;  %3385 = vmatpush1.bf16.msra.mxu1 %v5225_v39  ;;  %v3432_v38 = vld [vmem:[%s5929_s6 + $0x8] sm:$0xff]  ;;  %v4759_v39 = vpack.c.bf16 %v3448_v31, %v3447_v13  ;;  %v3471_v31 = vld [vmem:[%s5929_s6 + $0x140] sm:$0xff] }
 0x1f7   : > { %3222 = vmatprep.subr.bf16.mxu0 %v5230_v40  ;;  %3386 = vmatprep.subr.bf16.mxu1 %v5233_v41  ;;  %v4791_v40 = vpack.c.bf16 %v3480_v33, %v3479_v1  ;;  %v3463_v41 = vld [vmem:[%s5929_s6 + $0x100] sm:$0xff]  ;;  %v3472_v1 = vld [vmem:[%s5929_s6 + $0x148] sm:$0xff]  ;;  %v3457_v33 = vld [vmem:[%s5929_s6 + $0xd0] sm:$0xff] }
 0x1fa   : > { %3223 = vmatpush1.bf16.msra.mxu0 %v5228_v42  ;;  %3387 = vmatpush1.bf16.msra.mxu1 %v5231_v43  ;;  %v3464_v42 = vld [vmem:[%s5929_s6 + $0x108] sm:$0xff]  ;;  %v3449_v43 = vld [vmem:[%s5929_s6 + $0x90] sm:$0xff] }
 0x1fb   : > { %3224 = vmatprep.subr.bf16.mxu0 %v5236_v44  ;;  %3388 = vmatprep.subr.bf16.mxu1 %v5239_v45  ;;  %v1523_v44 = vsel %vm1507_vm7, %v1495_v24, %v1515_v30  ;;  %v3450_v45 = vld [vmem:[%s5929_s6 + $0x98] sm:$0xff]  ;;  %v3488_v24 = vld [vmem:[%s5929_s6 + $0x1c8] sm:$0xff]  ;;  %vm5381_vm7 = vmmov 0  }
 0x1fe   : > { %3225 = vmatpush1.bf16.msra.mxu0 %v5234_v47  ;;  %3389 = vmatpush1.bf16.msra.mxu1 %v5237_v48  ;;  %v3481_v47 = vld [vmem:[%s5929_s6 + $0x190] sm:$0xff]  ;;  %v3482_v48 = vld [vmem:[%s5929_s6 + $0x198] sm:$0xff] }
 0x1ff   : > { %3226 = vmatprep.subr.bf16.mxu0 %v5242_v49  ;;  %3390 = vmatprep.subr.bf16.mxu1 %v5245_v50  ;;  %v4761_v49 = vpack.c.bf16 %v3432_v38, %v3431_v36  ;;  %v4793_v50 = vpack.c.bf16 %v3464_v42, %v3463_v41  ;;  %v3490_v36 = vld [vmem:[%s5929_s6 + $0x1d8] sm:$0xff] }
 0x202   : > { %3227 = vmatpush1.bf16.msra.mxu0 %v5240_v32  ;;  %3391 = vmatpush1.bf16.msra.mxu1 %v5243_v37  ;;  %v3433_v32 = vld [vmem:[%s5929_s6 + $0x10] sm:$0xff]  ;;  %v3434_v37 = vld [vmem:[%s5929_s6 + $0x18] sm:$0xff] }
 0x203   : > { %3228 = vmatprep.subr.bf16.mxu0 %v5248_v51  ;;  %3392 = vmatprep.subr.bf16.mxu1 %v5251_v52  ;;  %v1531_v51 = vpack.c.bf16 %v1523_v44, %v1523_v44  ;;  %v4763_v52 = vpack.c.bf16 %v3450_v45, %v3449_v43  ;;  %v3442_v43 = vld [vmem:[%s5929_s6 + $0x58] sm:$0xff]  ;;  %v3473_v44 = vld [vmem:[%s5929_s6 + $0x150] sm:$0xff] }
 0x204   : > { %v3474_v45 = vld [vmem:[%s5929_s6 + $0x158] sm:$0xff] }
 0x206   : > { %3229 = vmatpush1.bf16.msra.mxu0 %v5246_v53  ;;  %3393 = vmatpush1.bf16.msra.mxu1 %v5249_v54  ;;  %v4795_v53 = vpack.c.bf16 %v3482_v48, %v3481_v47  ;;  %v3465_v54 = vld [vmem:[%s5929_s6 + $0x110] sm:$0xff]  ;;  %v4813_v48 = vpack.c.bf16 %v3474_v45, %v3473_v44 }
 0x207   : > { %3230 = vmatprep.subr.bf16.mxu0 %v5254_v55  ;;  %3394 = vmatprep.subr.bf16.mxu1 %v5257_v56  ;;  %v3466_v55 = vld [vmem:[%s5929_s6 + $0x118] sm:$0xff]  ;;  %v3451_v56 = vld [vmem:[%s5929_s6 + $0xa0] sm:$0xff] }
 0x20a   : > { %3231 = vmatpush1.bf16.msra.mxu0 %v5252_v57  ;;  %3395 = vmatpush1.bf16.msra.mxu1 %v5255_v58  ;;  %v3452_v57 = vld [vmem:[%s5929_s6 + $0xa8] sm:$0xff]  ;;  %v3483_v58 = vld [vmem:[%s5929_s6 + $0x1a0] sm:$0xff] }
 0x20b   : > { %3232 = vmatprep.subr.bf16.mxu0 %v5260_v59  ;;  %3396 = vmatprep.subr.bf16.mxu1 %v5263_v60  ;;  %v3484_v59 = vld [vmem:[%s5929_s6 + $0x1a8] sm:$0xff]  ;;  %v4765_v60 = vpack.c.bf16 %v3434_v37, %v3433_v32  ;;  %v3491_v32 = vld [vmem:[%s5929_s6 + $0x1e0] sm:$0xff] }
 0x20e   : > { %3233 = vmatpush1.bf16.msra.mxu0 %v5258_v61  ;;  %3397 = vmatpush1.bf16.msra.mxu1 %v5261_v62  ;;  %v4797_v61 = vpack.c.bf16 %v3466_v55, %v3465_v54  ;;  %v3435_v62 = vld [vmem:[%s5929_s6 + $0x20] sm:$0xff] }
 0x20f   : > { %3234 = vmatprep.subr.bf16.mxu0 %v5266_v63  ;;  %3398 = vmatprep.subr.bf16.mxu1 %v5269_v0  ;;  %v3436_v63 = vld [vmem:[%s5929_s6 + $0x28] sm:$0xff]  ;;  %v4767_v0 = vpack.c.bf16 %v3452_v57, %v3451_v56  ;;  %v3475_v56 = vld [vmem:[%s5929_s6 + $0x160] sm:$0xff] }
 0x210   : > { %v3476_v57 = vld [vmem:[%s5929_s6 + $0x168] sm:$0xff] }
 0x212   : > { %3235 = vmatpush1.bf16.msra.mxu0 %v5264_v2  ;;  %3399 = vmatpush1.bf16.msra.mxu1 %v5267_v4  ;;  %v4799_v2 = vpack.c.bf16 %v3484_v59, %v3483_v58  ;;  %v3467_v4 = vld [vmem:[%s5929_s6 + $0x120] sm:$0xff]  ;;  %v4817_v58 = vpack.c.bf16 %v3476_v57, %v3475_v56  ;;  %v3461_v59 = vld [vmem:[%s5929_s6 + $0xf0] sm:$0xff] }
 0x213   : > { %3236 = vmatprep.subr.bf16.mxu0 %v5272_v6  ;;  %3400 = vmatprep.subr.bf16.mxu1 %v5275_v7  ;;  %v3468_v6 = vld [vmem:[%s5929_s6 + $0x128] sm:$0xff]  ;;  %v3453_v7 = vld [vmem:[%s5929_s6 + $0xb0] sm:$0xff] }
 0x214   : > { %v4801_v15 = vpack.c.bf16 %v3468_v6, %v3467_v4 }
 0x216   : > { %3237 = vmatpush1.bf16.msra.mxu0 %v5270_v8  ;;  %3401 = vmatpush1.bf16.msra.mxu1 %v5273_v9  ;;  %v3454_v8 = vld [vmem:[%s5929_s6 + $0xb8] sm:$0xff]  ;;  %v3485_v9 = vld [vmem:[%s5929_s6 + $0x1b0] sm:$0xff] }
 0x217   : > { %3238 = vmatprep.subr.bf16.mxu0 %v5278_v10  ;;  %3402 = vmatprep.subr.bf16.mxu1 %v5281_v14  ;;  %v3486_v10 = vld [vmem:[%s5929_s6 + $0x1b8] sm:$0xff]  ;;  %v4769_v14 = vpack.c.bf16 %v3436_v63, %v3435_v62 }
 0x218   : > { %v3494_v63 = vld [vmem:[%s5929_s6 + $0x1f8] sm:$0xff] }
 0x21a   : > { %3239 = vmatpush1.bf16.msra.mxu0 %v5276_v16  ;;  %3403 = vmatpush1.bf16.msra.mxu1 %v5279_v17  ;;  %v3437_v16 = vld [vmem:[%s5929_s6 + $0x30] sm:$0xff]  ;;  %v3438_v17 = vld [vmem:[%s5929_s6 + $0x38] sm:$0xff] }
 0x21b   : > { %3240 = vmatprep.subr.bf16.mxu0 %v5284_v46  ;;  %3404 = vmatprep.subr.bf16.mxu1 %v5287_v5  ;;  %v4771_v46 = vpack.c.bf16 %v3454_v8, %v3453_v7  ;;  %v4803_v5 = vpack.c.bf16 %v3486_v10, %v3485_v9  ;;  %v3477_v7 = vld [vmem:[%s5929_s6 + $0x170] sm:$0xff]  ;;  %v3478_v8 = vld [vmem:[%s5929_s6 + $0x178] sm:$0xff]  ;;  %v5812_v10 = vld [vmem:[%s5924_s1] sm:$0x3] }
 0x21c   : > { %v4821_v9 = vpack.c.bf16 %v3478_v8, %v3477_v7 }
 0x21e   : > { %3241 = vmatpush1.bf16.msra.mxu0 %v5282_v20  ;;  %3405 = vmatpush1.bf16.msra.mxu1 %v5285_v21  ;;  %v3470_v20 = vld [vmem:[%s5929_s6 + $0x138] sm:$0xff]  ;;  %v3455_v21 = vld [vmem:[%s5929_s6 + $0xc0] sm:$0xff] }
 0x21f   : > { %3242 = vmatprep.subr.bf16.mxu0 %v5290_v22  ;;  %3406 = vmatprep.subr.bf16.mxu1 %v5293_v23  ;;  %v3456_v22 = vld [vmem:[%s5929_s6 + $0xc8] sm:$0xff]  ;;  %v3487_v23 = vld [vmem:[%s5929_s6 + $0x1c0] sm:$0xff] }
 0x220   : > { %v4775_v13 = vpack.c.bf16 %v3456_v22, %v3455_v21  ;;  %v4807_v30 = vpack.c.bf16 %v3488_v24, %v3487_v23  ;;  %v3792_v21 = vld [vmem:[%s5934_s11 + $0x18] sm:$0xff]  ;;  %v3925_v22 = vld [vmem:[%s5936_s13] sm:$0xff]  ;;  %v3926_v23 = vld [vmem:[%s5936_s13 + $0x8] sm:$0xff] }
 0x221   : > { %v5849_v24 = vld [vmem:[%s5937_s14] sm:$0x1] }
 0x222   : > { %3243 = vmatpush1.bf16.msra.mxu0 %v5288_v25  ;;  %3407 = vmatpush1.bf16.msra.mxu1 %v5291_v27  ;;  %v4773_v25 = vpack.c.bf16 %v3438_v17, %v3437_v16  ;;  %v4805_v27 = vpack.c.bf16 %v3470_v20, %v3469_v18  ;;  %v5378_v16 = vmov 0   ;;  %v3648_v17 = vld [vmem:[%s5932_s9 + $0x8] sm:$0xff]  ;;  %v3791_v20 = vld [vmem:[%s5934_s11 + $0x10] sm:$0xff] }
 0x223   : > { %3244 = vmatprep.subr.bf16.mxu0 %v5296_v29  ;;  %3408 = vmatprep.subr.bf16.mxu1 %v5299_v3  ;;  %v3439_v29 = vld [vmem:[%s5929_s6 + $0x40] sm:$0xff]  ;;  %v3440_v3 = vld [vmem:[%s5929_s6 + $0x48] sm:$0xff] }
 0x224   : > { %v4777_v38 = vpack.c.bf16 %v3440_v3, %v3439_v29  ;;  %4910 = vset.pattern.permute.xlu0 %v5378_v16  ;;  %4911 = vset.pattern.permute.xlu1 %v5378_v16  ;;  %v3790_v18 = vld [vmem:[%s5934_s11 + $0x8] sm:$0xff] }
 0x226   : > { %3245 = vmatpush1.bf16.msra.mxu0 %v5294_v34  ;;  %3409 = vmatpush1.bf16.msra.mxu1 %v5297_v35  ;;  %v3458_v34 = vld [vmem:[%s5929_s6 + $0xd8] sm:$0xff]  ;;  %v3489_v35 = vld [vmem:[%s5929_s6 + $0x1d0] sm:$0xff] }
 0x227   : > { %4760 = vmatprep.subr.bf16.mxu0 %v4759_v39  ;;  %4792 = vmatprep.subr.bf16.mxu1 %v4791_v40  ;;  %v4809_v39 = vpack.c.bf16 %v3472_v1, %v3471_v31  ;;  %v3441_v40 = vld [vmem:[%s5929_s6 + $0x50] sm:$0xff]  ;;  %v4779_v41 = vpack.c.bf16 %v3458_v34, %v3457_v33  ;;  %v4811_v42 = vpack.c.bf16 %v3490_v36, %v3489_v35 }
 0x228   : > { %v4781_v47 = vpack.c.bf16 %v3442_v43, %v3441_v40 }
 0x229   : > { %3247 = vmatmul.mubr.bf16.vlgmr.msra.gmra.mrb[8].mxu0 %v1531_v51  ;;  %3411 = vmatmul.mubr.bf16.vlgmr.msra.gmra.mrb[8].mxu1 %v1531_v51  ;;  %v3492_v51 = vld [vmem:[%s5929_s6 + $0x1e8] sm:$0xff] }
 0x22a   : > { %4762 = vmatpush3.bf16.msra.mxu0 %v4761_v49  ;;  %4794 = vmatpush3.bf16.msra.mxu1 %v4793_v50  ;;  %v3459_v49 = vld [vmem:[%s5929_s6 + $0xe0] sm:$0xff]  ;;  %v3460_v50 = vld [vmem:[%s5929_s6 + $0xe8] sm:$0xff]  ;;  %v4815_v54 = vpack.c.bf16 %v3492_v51, %v3491_v32  ;;  %v3645_v32 = vld [vmem:[%s5931_s8 + $0x10] sm:$0xff] }
 0x22b   : > { %4764 = vmatprep.subr.bf16.mxu0 %v4763_v52  ;;  %4796 = vmatprep.subr.bf16.mxu1 %v4795_v53  ;;  %v4783_v37 = vpack.c.bf16 %v3460_v50, %v3459_v49  ;;  %v3443_v52 = vld [vmem:[%s5929_s6 + $0x60] sm:$0xff]  ;;  %v3444_v53 = vld [vmem:[%s5929_s6 + $0x68] sm:$0xff] }
 0x22c   : > { %v4785_v55 = vpack.c.bf16 %v3444_v53, %v3443_v52  ;;  %v3644_v50 = vld [vmem:[%s5931_s8 + $0x8] sm:$0xff]  ;;  %v3785_v51 = vld [vmem:[%s5933_s10] sm:$0xff] }
 0x22e   : > { %4766 = vmatpush3.bf16.msra.mxu0 %v4765_v60  ;;  %4798 = vmatpush3.bf16.msra.mxu1 %v4797_v61  ;;  %v3462_v60 = vld [vmem:[%s5929_s6 + $0xf8] sm:$0xff]  ;;  %v3493_v61 = vld [vmem:[%s5929_s6 + $0x1f0] sm:$0xff] }
 0x22f   : > { %4768 = vmatprep.subr.bf16.mxu0 %v4767_v0  ;;  %4800 = vmatprep.subr.bf16.mxu1 %v4799_v2  ;;  %v4787_v62 = vpack.c.bf16 %v3462_v60, %v3461_v59  ;;  %v3445_v0 = vld [vmem:[%s5929_s6 + $0x70] sm:$0xff]  ;;  %v3446_v2 = vld [vmem:[%s5929_s6 + $0x78] sm:$0xff]  ;;  %v4819_v4 = vpack.c.bf16 %v3494_v63, %v3493_v61 }
 0x230   : > { %v4789_v6 = vpack.c.bf16 %v3446_v2, %v3445_v0 }
 0x232   : > { %4770 = vmatpush3.bf16.msra.mxu0 %v4769_v14  ;;  %4802 = vmatpush3.bf16.msra.mxu1 %v4801_v15  ;;  %v3647_v14 = vld [vmem:[%s5932_s9] sm:$0xff]  ;;  %v3649_v15 = vld [vmem:[%s5932_s9 + $0x10] sm:$0xff] }
 0x233   : > { %4772 = vmatprep.subr.bf16.mxu0 %v4771_v46  ;;  %4804 = vmatprep.subr.bf16.mxu1 %v4803_v5  ;;  %v3650_v46 = vld [vmem:[%s5932_s9 + $0x18] sm:$0xff]  ;;  %v3789_v5 = vld [vmem:[%s5934_s11] sm:$0xff] }
 0x234   : > { %3653 = vperm.xlu0 %4910, %v3647_v14   ;;  %3663 = vperm.xlu1 %4911, %v3649_v15  }
 0x236   : > { %4774 = vmatpush3.bf16.msra.mxu0 %v4773_v25  ;;  %4806 = vmatpush3.bf16.msra.mxu1 %v4805_v27  ;;  %v5379_v25 = vmov 1   ;;  %v1789_v27 = vld [vmem:[%s5928_s5] sm:$0xf] }
 0x237   : > { %4776 = vmatprep.subr.bf16.mxu0 %v4775_v13  ;;  %4808 = vmatprep.subr.bf16.mxu1 %v4807_v30  ;;  %v1794_v29 = vrot.slane %v1789_v27, %v5576_v12  ;;  %v1802_v3 = vrot.slane %v1789_v27, %v667_v28  ;;  %v1798_v13 = vrot.slane %v1789_v27, %v663_v19 }
 0x238   : > { %3658 = vperm.xlu0 %4910, %v3648_v17   ;;  %3668 = vperm.xlu1 %4911, %v3650_v46   ;;  %v1806_v30 = vrot.slane %v1789_v27, %v671_v26  ;;  %v3786_v27 = vld [vmem:[%s5933_s10 + $0x8] sm:$0xff] }
 0x23a   : > { %4778 = vmatpush3.bf16.msra.mxu0 %v4777_v38  ;;  %4810 = vmatpush3.bf16.msra.mxu1 %v4809_v39 }
 0x23b   : > { %4780 = vmatprep.subr.bf16.mxu0 %v4779_v41  ;;  %4812 = vmatprep.subr.bf16.mxu1 %v4811_v42 }
 0x23c   : > { %3795 = vperm.xlu0 %4910, %v3789_v5   ;;  %3800 = vperm.xlu1 %4911, %v3790_v18  }
 0x23e   : > { %4782 = vmatpush3.bf16.msra.mxu0 %v4781_v47  ;;  %4814 = vmatpush3.bf16.msra.mxu1 %v4813_v48  ;;  %v3643_v47 = vld [vmem:[%s5931_s8] sm:$0xff] }
 0x23f   : > { %4784 = vmatprep.subr.bf16.mxu0 %v4783_v37  ;;  %4816 = vmatprep.subr.bf16.mxu1 %v4815_v54  ;;  %v3646_v37 = vld [vmem:[%s5931_s8 + $0x18] sm:$0xff] }
 0x240   : > { %3805 = vperm.xlu0 %4910, %v3791_v20   ;;  %3810 = vperm.xlu1 %4911, %v3792_v21  }
 0x242   : > { %4786 = vmatpush3.bf16.msra.mxu0 %v4785_v55  ;;  %4818 = vmatpush3.bf16.msra.mxu1 %v4817_v58  ;;  %v4611_v55 = vld [vmem:[%s5930_s7] ss:$0 sm:$0xff] }
 0x243   : > { %4788 = vmatprep.subr.bf16.mxu0 %v4787_v62  ;;  %4820 = vmatprep.subr.bf16.mxu1 %v4819_v4 }
 0x244   : > { %3929 = vperm.xlu0 %4910, %v3925_v22   ;;  %3934 = vperm.xlu1 %4911, %v3926_v23  }
 0x246   : > { %4790 = vmatpush3.bf16.msra.mxu0 %v4789_v6  ;;  %4822 = vmatpush3.bf16.msra.mxu1 %v4821_v9 }
 0x247   : > { %4719 = vmatprep.subr.msk.mxu0 %vm3684_vm8, %v5812_v10 }
 0x248   : > { %4912 = vset.pattern.permute.xlu0 %v5379_v25  ;;  %4105 = vperm.xlu1 %4911, %v5849_v24  }
 0x249   : > { %4114 = vperm.xlu0 %4912, %v5849_v24  }
 0x2b3   : > { %v3654_v52 = vpop.permute.xlu0 %3653  ;;  %v3664_v58 = vpop.permute.xlu1 %3663 }
 0x2b7   : > { %v3659_v61 = vpop.permute.xlu0 %3658  ;;  %v3669_v8 = vpop.permute.xlu1 %3668 }
 0x2fc   : > { %v3248_v31 = vpop.f32.mrb[8].mxu0  ;;  %v3412_v1 = vpop.f32.mrb[8].mxu1 }
 0x2fd   : > { %v4842_v33 = vadd.f32 %v3248_v31, %v1794_v29  ;;  %v4844_v34 = vadd.f32 %v3412_v1, %v1802_v3  ;;  %v3250_v35 = vpop.f32.mrb[9].mxu0  ;;  %v3414_v36 = vpop.f32.mrb[9].mxu1  ;;  %v3787_v29 = vld [vmem:[%s5933_s10 + $0x10] sm:$0xff]  ;;  %v3788_v3 = vld [vmem:[%s5933_s10 + $0x18] sm:$0xff] }
 0x2fe   : > { %v4843_v38 = vadd.f32 %v3250_v35, %v1798_v13  ;;  %v4845_v39 = vadd.f32 %v3414_v36, %v1806_v30  ;;  %v3252_v40 = vpop.f32.mrb[10].mxu0  ;;  %v3416_v41 = vpop.f32.mrb[10].mxu1  ;;  %v3923_v13 = vld [vmem:[%s5935_s12] sm:$0xff] }
 0x2ff   : > { %vm3419_vm9 = vcmp.gt.f32.partialorder %v4842_v33, 0.0  ;;  %v3423_v42 = vmul.f32 0.01, %v4842_v33  ;;  %vm3421_vm10 = vcmp.gt.f32.partialorder %v4844_v34, 0.0  ;;  %v3425_v28 = vmul.f32 0.01, %v4844_v34  ;;  %v3801_v30 = vpop.permute.xlu1 %3800  ;;  %v3796_v31 = vpop.permute.xlu0 %3795 }
 0x300   : > { %v3424_v43 = vmul.f32 0.01, %v4843_v38  ;;  %v3426_v44 = vmul.f32 0.01, %v4845_v39  ;;  %v3253_v19 = vpop.f32.mrb[11].mxu0  ;;  %v3417_v45 = vpop.f32.mrb[11].mxu1 }
 0x301   : > { %vm3420_vm11 = vcmp.gt.f32.partialorder %v4843_v38, 0.0  ;;  %vm3422_vm12 = vcmp.gt.f32.partialorder %v4845_v39, 0.0  ;;  %v3427_v48 = vsel %vm3419_vm9, %v4842_v33, %v3423_v42  ;;  %v3429_v49 = vsel %vm3421_vm10, %v4844_v34, %v3425_v28 }
 0x302   : > { %v3428_v11 = vsel %vm3420_vm11, %v4843_v38, %v3424_v43  ;;  %v3430_v26 = vsel %vm3422_vm12, %v4845_v39, %v3426_v44  ;;  %vm4092_vm9 = vcmask 519168   ;;  %vm4145_vm10 = vcmask 516096  }
 0x303   : > { %3566 = vmatprep.mubr.f32.mxu0 %v3428_v11  ;;  %3636 = vmatprep.mubr.f32.mxu1 %v3430_v26  ;;  %v3811_v38 = vpop.permute.xlu1 %3810  ;;  %v3806_v41 = vpop.permute.xlu0 %3805 }
 0x304   : > { %3567 = vmatmul.mubr.f32.vlgmr.msra.gmra.mrb[12].mxu0 %v3427_v48  ;;  %3637 = vmatmul.mubr.f32.vlgmr.msra.gmra.mrb[12].mxu1 %v3429_v49 }
 0x305   : > { %4720 = vmatpush3.msk.msra.mxu0 %vm3684_vm8, %v5812_v10  ;;  %4721 = vmatprep.mubr.msk.f32.mxu0 %vm3671_vm13, %v3643_v47  ;;  %vm4018_vm8 = vcmask 130048  }
 0x306   : > { %4735 = vmatprep.mubr.msk.f32.mxu1 %vm3813_vm14, %v3785_v51  ;;  %v5383_v51 = vmov 2  }
 0x307   : > { %4913 = vset.pattern.permute.xlu1 %v5383_v51 }
 0x308   : > { %4722 = vmatmul.mubr.msk.f32.vlgmr.msra.gmra.mrb[14].mxu0 %vm3671_vm13, %v3644_v50  ;;  %v3924_v50 = vld [vmem:[%s5935_s12 + $0x8] sm:$0xff]  ;;  %4127 = vperm.xlu1 %4913, %v5849_v24  }
 0x309   : > { %4724 = vmatprep.mubr.msk.f32.mxu0 %vm3671_vm13, %v3645_v32  ;;  %v5380_v32 = vmov 0.0|0.0  }
 0x30c   : > { %4725 = vmatmul.mubr.msk.f32.gmra.mrb[16].mxu0 %vm3671_vm13, %v3646_v37  ;;  %v5382_v37 = vmov 0.0  }
 0x30d   : > { %4749 = vmatprep.mubr.msk.f32.mxu0 %vm3813_vm14, %v3923_v13 }
 0x3d7   : > { %v4659_v53 = vpop.f32.mrb[12].mxu0  ;;  %v4694_v54 = vpop.f32.mrb[12].mxu1 }
 0x3d8   : > { %v4660_v56 = vpop.f32.mrb[13].mxu0  ;;  %v4695_v57 = vpop.f32.mrb[13].mxu1 }
 0x3d9   : > { %v4661_v59 = vadd.f32 %v4660_v56, %v4659_v53  ;;  %v4696_v60 = vadd.f32 %v4695_v57, %v4694_v54  ;;  %v3935_v53 = vpop.permute.xlu1 %3934 }
 0x3db   : > { %v3569_v62 = vadd.f32 %v4661_v59, %v4611_v55  ;;  %v4723_v63 = vpop.f32.mrb[14].mxu0  ;;  %v3930_v55 = vpop.permute.xlu0 %3929 }
 0x3dc   : > { %v3760_v0 = vadd.f32 %v4723_v63, %v3659_v61  ;;  %v3754_v2 = vpop.f32.mrb[15].mxu0 }
 0x3dd   : > { %v5885_v4 = vadd.f32 %v4696_v60, %v3569_v62  ;;  %v3755_v6 = vadd.f32 %v3754_v2, %v3654_v52  ;;  %v5384_v52 = vmov 3  }
 0x3de   : > { %vm3774_vm15 = vcmp.gt.f32.partialorder %v3760_v0, 0.0  ;;  %v3778_v7 = vmul.f32 0.01, %v3760_v0  ;;  %4914 = vset.pattern.permute.xlu0 %v5384_v52 }
 0x3df   : > { %vm3773_vm0 = vcmp.gt.f32.partialorder %v3755_v6, 0.0  ;;  %v3777_v9 = vmul.f32 0.01, %v3755_v6  ;;  %v4726_v14 = vpop.f32.mrb[16].mxu0  ;;  %4137 = vperm.xlu0 %4914, %v5849_v24   ;;  %v4115_v61 = vpop.permute.xlu0 %4114 }
 0x3e0   : > { %v3770_v15 = vadd.f32 %v4726_v14, %v3669_v8  ;;  %v3764_v16 = vpop.f32.mrb[17].mxu0  ;;  %v3782_v17 = vsel %vm3774_vm15, %v3760_v0, %v3778_v7  ;;  %v4120_v2 = vrot.slane %v4115_v61, %v5576_v12 }
 0x3e1   : > { %v3765_v46 = vadd.f32 %v3764_v16, %v3664_v58  ;;  %v3781_v5 = vsel %vm3773_vm0, %v3755_v6, %v3777_v9  ;;  %v4106_v6 = vpop.permute.xlu1 %4105 }
 0x3e2   : > { %vm3776_vm1 = vcmp.gt.f32.partialorder %v3770_v15, 0.0  ;;  %v3780_v18 = vmul.f32 0.01, %v3770_v15  ;;  %v4823_v20 = vpack.c.bf16 %v3782_v17, %v3781_v5  ;;  %v4121_v8 = vmul.f32 %v4120_v2, %v5812_v10 }
 0x3e3   : > { %vm3775_vm2 = vcmp.gt.f32.partialorder %v3765_v46, 0.0  ;;  %v3779_v21 = vmul.f32 0.01, %v3765_v46  ;;  %v4111_v9 = vrot.slane %v4106_v6, %v5576_v12 }
 0x3e4   : > { %4824 = vmatprep.subr.bf16.mxu1 %v4823_v20  ;;  %v3784_v22 = vsel %vm3776_vm1, %v3770_v15, %v3780_v18 }
 0x3e5   : > { %4826 = vmatpush3.bf16.msra.mxu1 %v4823_v20  ;;  %v3783_v23 = vsel %vm3775_vm2, %v3765_v46, %v3779_v21  ;;  %v4128_v15 = vpop.permute.xlu1 %4127  ;;  %v4112_v17 = vmul.f32 %v4111_v9, %v5812_v10 }
 0x3e6   : > { %v4827_v25 = vpack.c.bf16 %v3784_v22, %v3783_v23  ;;  %v4133_v5 = vrot.slane %v4128_v15, %v5576_v12 }
 0x3e8   : > { %4828 = vmatprep.subr.bf16.mxu1 %v4827_v25 }
 0x3e9   : > { %4830 = vmatpush3.bf16.msra.mxu1 %v4827_v25 }
 0x3ec   : > { %4736 = vmatmul.mubr.msk.f32.vlgmr.msra.gmra.mrb[14].mxu1 %vm3813_vm14, %v3786_v27 }
 0x3ed   : > { %4738 = vmatprep.mubr.msk.f32.mxu1 %vm3813_vm14, %v3787_v29 }
 0x3f0   : > { %4739 = vmatmul.mubr.msk.f32.gmra.mrb[16].mxu1 %vm3813_vm14, %v3788_v3 }
 0x45e   : > { %v4138_v18 = vpop.permute.xlu0 %4137 }
 0x45f   : > { %v4143_v23 = vrot.slane %v4138_v18, %v5576_v12 }
 0x4bf   : > { %v4737_v1 = vpop.f32.mrb[14].mxu1 }
 0x4c0   : > { %v3898_v33 = vadd.f32 %v4737_v1, %v3801_v30  ;;  %v3892_v34 = vpop.f32.mrb[15].mxu1 }
 0x4c1   : > { %v3893_v35 = vadd.f32 %v3892_v34, %v3796_v31 }
 0x4c2   : > { %vm3912_vm3 = vcmp.gt.f32.partialorder %v3898_v33, 0.0  ;;  %v3916_v36 = vmul.f32 0.01, %v3898_v33 }
 0x4c3   : > { %vm3911_vm4 = vcmp.gt.f32.partialorder %v3893_v35, 0.0  ;;  %v3915_v39 = vmul.f32 0.01, %v3893_v35  ;;  %v4740_v40 = vpop.f32.mrb[16].mxu1 }
 0x4c4   : > { %v3908_v42 = vadd.f32 %v4740_v40, %v3811_v38  ;;  %v3902_v28 = vpop.f32.mrb[17].mxu1  ;;  %v3920_v43 = vsel %vm3912_vm3, %v3898_v33, %v3916_v36 }
 0x4c5   : > { %v3903_v44 = vadd.f32 %v3902_v28, %v3806_v41  ;;  %v3919_v19 = vsel %vm3911_vm4, %v3893_v35, %v3915_v39 }
 0x4c6   : > { %vm3914_vm5 = vcmp.gt.f32.partialorder %v3908_v42, 0.0  ;;  %v3918_v45 = vmul.f32 0.01, %v3908_v42  ;;  %v4831_v11 = vpack.c.bf16 %v3920_v43, %v3919_v19 }
 0x4c7   : > { %vm3913_vm6 = vcmp.gt.f32.partialorder %v3903_v44, 0.0  ;;  %v3917_v26 = vmul.f32 0.01, %v3903_v44 }
 0x4c8   : > { %4832 = vmatprep.subr.bf16.mxu0 %v4831_v11  ;;  %v3922_v47 = vsel %vm3914_vm5, %v3908_v42, %v3918_v45 }
 0x4c9   : > { %4834 = vmatpush3.bf16.msra.mxu0 %v4831_v11  ;;  %v3921_v48 = vsel %vm3913_vm6, %v3903_v44, %v3917_v26 }
 0x4ca   : > { %v4835_v49 = vpack.c.bf16 %v3922_v47, %v3921_v48 }
 0x4cc   : > { %4836 = vmatprep.subr.bf16.mxu0 %v4835_v49 }
 0x4cd   : > { %4838 = vmatpush3.bf16.msra.mxu0 %v4835_v49 }
 0x4ce   : > { %4839 = vmatprep.subr.bf16.mxu0 %v5380_v32 }
 0x4d0   : > { %4750 = vmatmul.mubr.msk.f32.vlgmr.msra.gmra.mrb[18].mxu0 %vm3813_vm14, %v3924_v50 }
 0x4d1   : > { %4756 = vmatprep.mubr.msk.f32.mxu0 %vm5381_vm7, %v5382_v37 }
 0x5a3   : > { %v4751_v54 = vpop.f32.mrb[18].mxu0 }
 0x5a4   : > { %v4015_v56 = vadd.f32 %v4751_v54, %v3935_v53  ;;  %v4009_v57 = vpop.f32.mrb[19].mxu0 }
 0x5a5   : > { %v4010_v58 = vadd.f32 %v4009_v57, %v3930_v55 }
 0x5a7   : > { %v4840_v59 = vpack.c.bf16 %v4015_v56, %v4010_v58 }
 0x5a9   : > { %4841 = vmatpush3.bf16.msra.mxu0 %v4840_v59 }
 0x5ac   : > { %4757 = vmatmul.mubr.msk.f32.vlgmr.msra.gmra.mrb[20].mxu0 %vm4018_vm8, %v5885_v4  ;;  %v4123_v4 = vrot.slane %v4121_v8, 1 }
 0x5ae   : > { %v4125_v21 = vadd.f32 %v4123_v4, %v4112_v17 }
 0x67f   : > { %v4088_v60 = vpop.f32.mrb[20].mxu0 }
 0x680   : > { %v4093_v62 = vsel %vm4092_vm9, %v4088_v60, 0.0  ;;  %v4758_v63 = vpop.f32.mrb[21].mxu0 }
 0x681   : > { %v4094_v0 = vrot.slane %v4093_v62, 4 }
 0x683   : > { %v4095_v24 = vadd.f32 %v4094_v0, %v4093_v62 }
 0x685   : > { %v4096_v7 = vrot.slane %v4095_v24, 2 }
 0x687   : > { %v4097_v14 = vadd.f32 %v4096_v7, %v4095_v24 }
 0x689   : > { %v4098_v16 = vrot.slane %v4097_v14, 1 }
 0x68b   : > { %v4099_v46 = vadd.f32 %v4098_v16, %v4097_v14 }
 0x68d   : > { %v4101_v20 = vmul.f32 0.25, %v4099_v46 }
 0x68f   : > { %v4134_v22 = vmul.f32 %v4133_v5, %v4101_v20 }
 0x691   : > { %v4135_v25 = vadd.f32 %v4134_v22, %v4125_v21 }
 0x693   : > { %v4144_v27 = vadd.f32 %v4143_v23, %v4135_v25 }
 0x695   : > { %4146 = vst.msk [vmem:[%s520_s29] sm:$0x1] %vm4145_vm10, %v4144_v27 }
 0x696 PF: > { %s5952_s30 = sld [smem:[#allocation8_spill]] }
 0x69c   : > { %s27_s18 = sadd.s32 1, %s5952_s30  }
 0x69d   : > { %p24_p5 = scmp.ge.s32.totalorder %s27_s18, 4  }
 0x69f   :  { %26 = sbr.rel (!%p24_p5) target bundleno = 4 (0x4), region = 119 }
 0x6a6   :  { %4164 = vsyncpa [#allocation3], 1 }
 0x6a7   :  { %4166 = vsyncpa [#allocation3 + $0x1], 1 }
 0x6a8   :  { %4167 = vsyncpa [#allocation5], 1 }

</bundles_post_ra>
